<compile_context>
chip_gen: v7x
topology: tpu7x:2x2x1
jax: 0.10.0
libtpu: 0.0.40
codegen_flags: <defaults>
</compile_context>

<pallas_src>
import functools

import jax
import jax.numpy as jnp
from jax.experimental import pallas as pl
from jax.experimental.pallas import tpu as pltpu


def _dense_block_kernel(x_ref, w_ref, b_ref, o_ref, xpad_ref, col_ref, *,
                        H, W, KH, KW, Cin, Cout, pad):
    # x_ref   : (1, H, W, Cin)                 unpadded input block (one image)
    # w_ref   : (KH*KW*Cin, Cout)              weights, tap-major / Cin-minor
    # b_ref   : (1, Cout)
    # o_ref   : (1, H, W, Cin + Cout)          fused [x | ReLU(conv)] output
    # xpad_ref: VMEM (H+2p, W+2p, Cin)         padded copy of the input
    # col_ref : VMEM (H*W, KH*KW*Cin)          im2col matrix

    # Build the halo in VMEM (zero the whole scratch every step: it is a tiny
    # in-VMEM fill and avoids relying on a specific grid step running on every
    # core under megacore sharding).
    xpad_ref[...] = jnp.zeros_like(xpad_ref)
    x_tile = x_ref[0]                                   # (H, W, Cin)
    xpad_ref[pad:pad + H, pad:pad + W, :] = x_tile

    # im2col into the VMEM scratch: column block t = tap (kh, kw). The column
    # ordering matches the row-major reshape of the HWIO weight, so a single
    # MXU matmul with K = KH*KW*Cin replaces the 9 per-tap matmuls.
    for kh in range(KH):
        for kw in range(KW):
            t = kh * KW + kw
            col_ref[:, t * Cin:(t + 1) * Cin] = (
                xpad_ref[kh:kh + H, kw:kw + W, :].reshape(H * W, Cin))

    acc = jnp.dot(col_ref[...], w_ref[...],
                  preferred_element_type=jnp.float32)    # (H*W, Cout), f32 acc
    acc = jnp.maximum(acc + b_ref[...].astype(jnp.float32), 0.0)

    # Fused concat: channels [0:Cin] <- x (already resident in VMEM),
    #               channels [Cin:]  <- ReLU(conv).
    o_ref[0, :, :, 0:Cin] = x_tile.astype(o_ref.dtype)
    o_ref[0, :, :, Cin:Cin + Cout] = (
        acc.reshape(H, W, Cout).astype(o_ref.dtype))


def dense_block_nhwc(x_nhwc, w_hwio, b):
    """Fused DenseBlock in NHWC: returns (N, H, W, Cin + Cout)."""
    N, H, W, Cin = x_nhwc.shape
    KH, KW, wcin, Cout = w_hwio.shape
    assert wcin == Cin
    # PyTorch uses padding = kernel_size >> 1; that only equals SAME for odd k.
    assert KH % 2 == 1 and KW % 2 == 1, "only odd kernel sizes supported"
    pad = KH >> 1
    Ctot = Cin + Cout

    # (KH, KW, Cin, Cout) -> (KH*KW*Cin, Cout); row-major flatten matches the
    # im2col column order built in the kernel. Compute dtype = input dtype.
    w2d = w_hwio.reshape(KH * KW * Cin, Cout).astype(x_nhwc.dtype)
    b2 = b.reshape(1, Cout)

    kernel = functools.partial(_dense_block_kernel, H=H, W=W, KH=KH, KW=KW,
                               Cin=Cin, Cout=Cout, pad=pad)

    return pl.pallas_call(
        kernel,
        out_shape=jax.ShapeDtypeStruct((N, H, W, Ctot), x_nhwc.dtype),
        grid_spec=pltpu.PrefetchScalarGridSpec(
            num_scalar_prefetch=0,
            grid=(N,),
            in_specs=[
                pl.BlockSpec((1, H, W, Cin), lambda n: (n, 0, 0, 0)),
                pl.BlockSpec((KH * KW * Cin, Cout), lambda n: (0, 0)),
                pl.BlockSpec((1, Cout), lambda n: (0, 0)),
            ],
            out_specs=pl.BlockSpec((1, H, W, Ctot), lambda n: (n, 0, 0, 0)),
            scratch_shapes=[
                pltpu.VMEM((H + 2 * pad, W + 2 * pad, Cin), x_nhwc.dtype),
                pltpu.VMEM((H * W, KH * KW * Cin), x_nhwc.dtype),
            ],
        ),
        compiler_params=pltpu.CompilerParams(
            dimension_semantics=("parallel",),
            vmem_limit_bytes=32 * 1024 * 1024,
        ),
    )(x_nhwc, w2d, b2)


def dense_block_forward(x_nchw, w_oihw, b):
    """PyTorch-semantics DenseBlock forward (NCHW in / NCHW out).

    For a chain of DenseBlocks, prefer `dense_block_nhwc` and transpose once
    at the network boundary instead of per block.
    """
    x_nhwc = jnp.transpose(x_nchw, (0, 2, 3, 1))
    w_hwio = jnp.transpose(w_oihw, (2, 3, 1, 0))
    y_nhwc = dense_block_nhwc(x_nhwc, w_hwio, b)
    return jnp.transpose(y_nhwc, (0, 3, 1, 2))


def _reference_forward(x_nchw, w_oihw, b):
    # pure-JAX reference for correctness checks
    out = jax.lax.conv_general_dilated(
        x_nchw, w_oihw, window_strides=(1, 1), padding="SAME",
        dimension_numbers=("NCHW", "OIHW", "NCHW"))
    out = jnp.maximum(out + b[None, :, None, None], 0.0)
    return jnp.concatenate((x_nchw, out), axis=1)


if __name__ == "__main__":
    key = jax.random.PRNGKey(0)
    kx, kw1, kb1, kw2, kb2 = jax.random.split(key, 5)

    N, Cin, H, W = 2, 4, 16, 16
    Cout, K = 8, 3

    x = jax.random.normal(kx, (N, Cin, H, W), dtype=jnp.float32)

    # Deterministic init mimicking PyTorch Conv2d default (uniform +/- 1/sqrt(fan_in))
    fan_in1 = Cin * K * K
    bnd1 = 1.0 / (fan_in1 ** 0.5)
    w1 = jax.random.uniform(kw1, (Cout, Cin, K, K), jnp.float32, -bnd1, bnd1)
    b1 = jax.random.uniform(kb1, (Cout,), jnp.float32, -bnd1, bnd1)

    # Single-block check through the NCHW boundary wrapper.
    y = dense_block_forward(x, w1, b1)
    y = jax.block_until_ready(y)
    y_ref = _reference_forward(x, w1, b1)
    assert y.shape == (N, Cin + Cout, H, W), y.shape
    assert jnp.allclose(y, y_ref, atol=1e-4, rtol=1e-4), "block1 mismatch"

    # Two-block chain kept entirely in NHWC (transposes only at the boundary),
    # as a typical RDN would do.
    Cin2 = Cin + Cout
    fan_in2 = Cin2 * K * K
    bnd2 = 1.0 / (fan_in2 ** 0.5)
    w2 = jax.random.uniform(kw2, (Cout, Cin2, K, K), jnp.float32, -bnd2, bnd2)
    b2 = jax.random.uniform(kb2, (Cout,), jnp.float32, -bnd2, bnd2)

    x_nhwc = jnp.transpose(x, (0, 2, 3, 1))
    y1 = dense_block_nhwc(x_nhwc, jnp.transpose(w1, (2, 3, 1, 0)), b1)
    y2 = dense_block_nhwc(y1, jnp.transpose(w2, (2, 3, 1, 0)), b2)
    y2 = jax.block_until_ready(y2)
    y2_nchw = jnp.transpose(y2, (0, 3, 1, 2))
    y2_ref = _reference_forward(_reference_forward(x, w1, b1), w2, b2)
    assert y2_nchw.shape == (N, Cin2 + Cout, H, W), y2_nchw.shape
    assert jnp.allclose(y2_nchw, y2_ref, atol=1e-4, rtol=1e-4), "chain mismatch"

    print("KERNEL_OK")
</pallas_src>

<mosaic_0001>
module attributes {stable_mosaic.version = 11 : i64} {
  func.func @_dense_block_kernel(%arg0: i32, %arg1: memref<1x16x16x4xf32, #tpu.memory_space<vmem>>, %arg2: memref<36x8xf32, #tpu.memory_space<vmem>>, %arg3: memref<1x8xf32, #tpu.memory_space<vmem>>, %arg4: memref<1x16x16x12xf32, #tpu.memory_space<vmem>>, %arg5: memref<18x18x4xf32, #tpu.memory_space<vmem>>, %arg6: memref<256x36xf32, #tpu.memory_space<vmem>>) attributes {dimension_semantics = [#tpu.dimension_semantics<parallel>], iteration_bounds = array<i64: 2>, scalar_prefetch = 0 : i64, scratch_operands = 2 : i64, tpu.core_type = #tpu.core_type<tc>, window_params = [{transform_indices = @transform_0, window_bounds = array<i64: 1, 16, 16, 4>}, {pipeline_mode = #tpu.pipeline_mode<synchronous>, transform_indices = @transform_1, window_bounds = array<i64: 36, 8>}, {pipeline_mode = #tpu.pipeline_mode<synchronous>, transform_indices = @transform_2, window_bounds = array<i64: 1, 8>}, {transform_indices = @transform_3, window_bounds = array<i64: 1, 16, 16, 12>}]} {
    %cst = arith.constant 0.000000e+00 : f32
    %0 = vector.broadcast %cst : f32 to vector<18x18x4xf32>
    %c0 = arith.constant 0 : index
    %c0_0 = arith.constant 0 : index
    %c0_1 = arith.constant 0 : index
    %1 = vector.load %arg5[%c0, %c0_0, %c0_1] : memref<18x18x4xf32, #tpu.memory_space<vmem>>, vector<18x18x4xf32>
    tpu.vector_store %arg5[%c0, %c0_0, %c0_1], %0 {strides = array<i32>} : memref<18x18x4xf32, #tpu.memory_space<vmem>>, vector<18x18x4xf32>,
    %c0_2 = arith.constant 0 : index
    %c0_3 = arith.constant 0 : index
    %c0_4 = arith.constant 0 : index
    %c0_5 = arith.constant 0 : index
    %2 = vector.load %arg1[%c0_2, %c0_3, %c0_4, %c0_5] : memref<1x16x16x4xf32, #tpu.memory_space<vmem>>, vector<1x16x16x4xf32>
    %3 = vector.shape_cast %2 : vector<1x16x16x4xf32> to vector<16x16x4xf32>
    %c1 = arith.constant 1 : index
    %c1_6 = arith.constant 1 : index
    %c0_7 = arith.constant 0 : index
    %4 = vector.load %arg5[%c1, %c1_6, %c0_7] : memref<18x18x4xf32, #tpu.memory_space<vmem>>, vector<16x16x4xf32>
    tpu.vector_store %arg5[%c1, %c1_6, %c0_7], %3 {strides = array<i32>} : memref<18x18x4xf32, #tpu.memory_space<vmem>>, vector<16x16x4xf32>,
    %c0_8 = arith.constant 0 : index
    %c0_9 = arith.constant 0 : index
    %c0_10 = arith.constant 0 : index
    %5 = vector.load %arg5[%c0_8, %c0_9, %c0_10] : memref<18x18x4xf32, #tpu.memory_space<vmem>>, vector<16x16x4xf32>
    %6 = vector.shape_cast %5 : vector<16x16x4xf32> to vector<256x4xf32>
    %c0_11 = arith.constant 0 : index
    %c0_12 = arith.constant 0 : index
    %7 = vector.load %arg6[%c0_11, %c0_12] : memref<256x36xf32, #tpu.memory_space<vmem>>, vector<256x4xf32>
    tpu.vector_store %arg6[%c0_11, %c0_12], %6 {strides = array<i32>} : memref<256x36xf32, #tpu.memory_space<vmem>>, vector<256x4xf32>,
    %c0_13 = arith.constant 0 : index
    %c1_14 = arith.constant 1 : index
    %c0_15 = arith.constant 0 : index
    %8 = vector.load %arg5[%c0_13, %c1_14, %c0_15] : memref<18x18x4xf32, #tpu.memory_space<vmem>>, vector<16x16x4xf32>
    %9 = vector.shape_cast %8 : vector<16x16x4xf32> to vector<256x4xf32>
    %c0_16 = arith.constant 0 : index
    %c4 = arith.constant 4 : index
    %10 = vector.load %arg6[%c0_16, %c4] : memref<256x36xf32, #tpu.memory_space<vmem>>, vector<256x4xf32>
    tpu.vector_store %arg6[%c0_16, %c4], %9 {strides = array<i32>} : memref<256x36xf32, #tpu.memory_space<vmem>>, vector<256x4xf32>,
    %c0_17 = arith.constant 0 : index
    %c2 = arith.constant 2 : index
    %c0_18 = arith.constant 0 : index
    %11 = vector.load %arg5[%c0_17, %c2, %c0_18] : memref<18x18x4xf32, #tpu.memory_space<vmem>>, vector<16x16x4xf32>
    %12 = vector.shape_cast %11 : vector<16x16x4xf32> to vector<256x4xf32>
    %c0_19 = arith.constant 0 : index
    %c8 = arith.constant 8 : index
    %13 = vector.load %arg6[%c0_19, %c8] : memref<256x36xf32, #tpu.memory_space<vmem>>, vector<256x4xf32>
    tpu.vector_store %arg6[%c0_19, %c8], %12 {strides = array<i32>} : memref<256x36xf32, #tpu.memory_space<vmem>>, vector<256x4xf32>,
    %c1_20 = arith.constant 1 : index
    %c0_21 = arith.constant 0 : index
    %c0_22 = arith.constant 0 : index
    %14 = vector.load %arg5[%c1_20, %c0_21, %c0_22] : memref<18x18x4xf32, #tpu.memory_space<vmem>>, vector<16x16x4xf32>
    %15 = vector.shape_cast %14 : vector<16x16x4xf32> to vector<256x4xf32>
    %c0_23 = arith.constant 0 : index
    %c12 = arith.constant 12 : index
    %16 = vector.load %arg6[%c0_23, %c12] : memref<256x36xf32, #tpu.memory_space<vmem>>, vector<256x4xf32>
    tpu.vector_store %arg6[%c0_23, %c12], %15 {strides = array<i32>} : memref<256x36xf32, #tpu.memory_space<vmem>>, vector<256x4xf32>,
    %c1_24 = arith.constant 1 : index
    %c1_25 = arith.constant 1 : index
    %c0_26 = arith.constant 0 : index
    %17 = vector.load %arg5[%c1_24, %c1_25, %c0_26] : memref<18x18x4xf32, #tpu.memory_space<vmem>>, vector<16x16x4xf32>
    %18 = vector.shape_cast %17 : vector<16x16x4xf32> to vector<256x4xf32>
    %c0_27 = arith.constant 0 : index
    %c16 = arith.constant 16 : index
    %19 = vector.load %arg6[%c0_27, %c16] : memref<256x36xf32, #tpu.memory_space<vmem>>, vector<256x4xf32>
    tpu.vector_store %arg6[%c0_27, %c16], %18 {strides = array<i32>} : memref<256x36xf32, #tpu.memory_space<vmem>>, vector<256x4xf32>,
    %c1_28 = arith.constant 1 : index
    %c2_29 = arith.constant 2 : index
    %c0_30 = arith.constant 0 : index
    %20 = vector.load %arg5[%c1_28, %c2_29, %c0_30] : memref<18x18x4xf32, #tpu.memory_space<vmem>>, vector<16x16x4xf32>
    %21 = vector.shape_cast %20 : vector<16x16x4xf32> to vector<256x4xf32>
    %c0_31 = arith.constant 0 : index
    %c20 = arith.constant 20 : index
    %22 = vector.load %arg6[%c0_31, %c20] : memref<256x36xf32, #tpu.memory_space<vmem>>, vector<256x4xf32>
    tpu.vector_store %arg6[%c0_31, %c20], %21 {strides = array<i32>} : memref<256x36xf32, #tpu.memory_space<vmem>>, vector<256x4xf32>,
    %c2_32 = arith.constant 2 : index
    %c0_33 = arith.constant 0 : index
    %c0_34 = arith.constant 0 : index
    %23 = vector.load %arg5[%c2_32, %c0_33, %c0_34] : memref<18x18x4xf32, #tpu.memory_space<vmem>>, vector<16x16x4xf32>
    %24 = vector.shape_cast %23 : vector<16x16x4xf32> to vector<256x4xf32>
    %c0_35 = arith.constant 0 : index
    %c24 = arith.constant 24 : index
    %25 = vector.load %arg6[%c0_35, %c24] : memref<256x36xf32, #tpu.memory_space<vmem>>, vector<256x4xf32>
    tpu.vector_store %arg6[%c0_35, %c24], %24 {strides = array<i32>} : memref<256x36xf32, #tpu.memory_space<vmem>>, vector<256x4xf32>,
    %c2_36 = arith.constant 2 : index
    %c1_37 = arith.constant 1 : index
    %c0_38 = arith.constant 0 : index
    %26 = vector.load %arg5[%c2_36, %c1_37, %c0_38] : memref<18x18x4xf32, #tpu.memory_space<vmem>>, vector<16x16x4xf32>
    %27 = vector.shape_cast %26 : vector<16x16x4xf32> to vector<256x4xf32>
    %c0_39 = arith.constant 0 : index
    %c28 = arith.constant 28 : index
    %28 = vector.load %arg6[%c0_39, %c28] : memref<256x36xf32, #tpu.memory_space<vmem>>, vector<256x4xf32>
    tpu.vector_store %arg6[%c0_39, %c28], %27 {strides = array<i32>} : memref<256x36xf32, #tpu.memory_space<vmem>>, vector<256x4xf32>,
    %c2_40 = arith.constant 2 : index
    %c2_41 = arith.constant 2 : index
    %c0_42 = arith.constant 0 : index
    %29 = vector.load %arg5[%c2_40, %c2_41, %c0_42] : memref<18x18x4xf32, #tpu.memory_space<vmem>>, vector<16x16x4xf32>
    %30 = vector.shape_cast %29 : vector<16x16x4xf32> to vector<256x4xf32>
    %c0_43 = arith.constant 0 : index
    %c32 = arith.constant 32 : index
    %31 = vector.load %arg6[%c0_43, %c32] : memref<256x36xf32, #tpu.memory_space<vmem>>, vector<256x4xf32>
    tpu.vector_store %arg6[%c0_43, %c32], %30 {strides = array<i32>} : memref<256x36xf32, #tpu.memory_space<vmem>>, vector<256x4xf32>,
    %c0_44 = arith.constant 0 : index
    %c0_45 = arith.constant 0 : index
    %32 = vector.load %arg6[%c0_44, %c0_45] : memref<256x36xf32, #tpu.memory_space<vmem>>, vector<256x36xf32>
    %c0_46 = arith.constant 0 : index
    %c0_47 = arith.constant 0 : index
    %33 = vector.load %arg2[%c0_46, %c0_47] : memref<36x8xf32, #tpu.memory_space<vmem>>, vector<36x8xf32>
    %cst_48 = arith.constant dense<0.000000e+00> : vector<256x8xf32>
    %34 = tpu.matmul %32, %33, %cst_48 {dimension_numbers = #tpu.dot_dimension_numbers<[1], [0], [0], [1], [0, 0, 1, 1], [], []>} : vector<256x36xf32>, vector<36x8xf32>, vector<256x8xf32> -> vector<256x8xf32>
    %c0_49 = arith.constant 0 : index
    %c0_50 = arith.constant 0 : index
    %35 = vector.load %arg3[%c0_49, %c0_50] : memref<1x8xf32, #tpu.memory_space<vmem>>, vector<1x8xf32>
    %36 = vector.broadcast %35 : vector<1x8xf32> to vector<256x8xf32>
    %37 = arith.addf %34, %36 : vector<256x8xf32>
    %cst_51 = arith.constant 0.000000e+00 : f32
    %38 = vector.broadcast %cst_51 : f32 to vector<256x8xf32>
    %39 = arith.maximumf %37, %38 : vector<256x8xf32>
    %c0_52 = arith.constant 0 : index
    %c0_53 = arith.constant 0 : index
    %c0_54 = arith.constant 0 : index
    %c0_55 = arith.constant 0 : index
    %40 = vector.load %arg4[%c0_52, %c0_53, %c0_54, %c0_55] : memref<1x16x16x12xf32, #tpu.memory_space<vmem>>, vector<1x16x16x4xf32>
    %41 = vector.shape_cast %40 : vector<1x16x16x4xf32> to vector<16x16x4xf32>
    %42 = vector.shape_cast %3 : vector<16x16x4xf32> to vector<1x16x16x4xf32>
    tpu.vector_store %arg4[%c0_52, %c0_53, %c0_54, %c0_55], %42 {strides = array<i32>} : memref<1x16x16x12xf32, #tpu.memory_space<vmem>>, vector<1x16x16x4xf32>,
    %43 = vector.shape_cast %39 : vector<256x8xf32> to vector<16x16x8xf32>
    %c0_56 = arith.constant 0 : index
    %c0_57 = arith.constant 0 : index
    %c0_58 = arith.constant 0 : index
    %c4_59 = arith.constant 4 : index
    %44 = vector.load %arg4[%c0_56, %c0_57, %c0_58, %c4_59] : memref<1x16x16x12xf32, #tpu.memory_space<vmem>>, vector<1x16x16x8xf32>
    %45 = vector.shape_cast %44 : vector<1x16x16x8xf32> to vector<16x16x8xf32>
    %46 = vector.shape_cast %43 : vector<16x16x8xf32> to vector<1x16x16x8xf32>
    tpu.vector_store %arg4[%c0_56, %c0_57, %c0_58, %c4_59], %46 {strides = array<i32>} : memref<1x16x16x12xf32, #tpu.memory_space<vmem>>, vector<1x16x16x8xf32>,
    return
  }
  func.func @transform_0(%arg0: i32) -> (i32, i32, i32, i32) {
    %c0_i32 = arith.constant 0 : i32
    %c0_i32_0 = arith.constant 0 : i32
    %c0_i32_1 = arith.constant 0 : i32
    %c0_i32_2 = arith.constant 0 : i32
    return %arg0, %c0_i32, %c0_i32_0, %c0_i32_1 : i32, i32, i32, i32
  }
  func.func @transform_1(%arg0: i32) -> (i32, i32) {
    %c0_i32 = arith.constant 0 : i32
    %c0_i32_0 = arith.constant 0 : i32
    %c0_i32_1 = arith.constant 0 : i32
    return %c0_i32, %c0_i32_0 : i32, i32
  }
  func.func @transform_2(%arg0: i32) -> (i32, i32) {
    %c0_i32 = arith.constant 0 : i32
    %c0_i32_0 = arith.constant 0 : i32
    %c0_i32_1 = arith.constant 0 : i32
    return %c0_i32, %c0_i32_0 : i32, i32
  }
  func.func @transform_3(%arg0: i32) -> (i32, i32, i32, i32) {
    %c0_i32 = arith.constant 0 : i32
    %c0_i32_0 = arith.constant 0 : i32
    %c0_i32_1 = arith.constant 0 : i32
    %c0_i32_2 = arith.constant 0 : i32
    return %arg0, %c0_i32, %c0_i32_0, %c0_i32_1 : i32, i32, i32, i32
  }
}

</mosaic_0001>

<bundles_post_ra>
// kernel: tpu_custom_call.1
= control target key start
LH: loop header
LB: loop body
LE: loop exit
PB: predicated region body
PF: predicated region fallthrough
CT: control target
= control target key end

     0   :  { %s2761_s12 = smov 0   ;;  %s3975_s0 = inlined_call_operand.vmem [shape: f32[2,16,16,4], index: 0, kind: input, shape index: {}]   ;;  %s3976_s1 = inlined_call_operand.vmem [shape: f32[36,8], index: 1, kind: input, shape index: {}]   ;;  %s3977_s2 = inlined_call_operand.vmem [shape: f32[1,8], index: 2, kind: input, shape index: {}]   ;;  %s3978_s3 = inlined_call_operand.vmem [shape: f32[2,16,16,12], index: 3, kind: output, shape index: {}]  }
   0x1 LB: > { %s2551_s13 = sadd.s32 4294967295, %s2730_s12   ;;  %p2555_p0 = scmp.ge.s32.totalorder %s2730_s12, 1  ;;  %s2730_s12 = sphi %s2761_s12, %s13_s12  }
   0x2   : > { %p137_p1 = scmp.lt.s32.totalorder %s2730_s12, 3 }
   0x4   : > { %p138_p2 = pnand %p2555_p0, %p137_p1 }
   0x5   : > { %vm171_vm0 = vcmask (!%p138_p2), 31744   ;;  %vm174_vm1 = vcmask (!%p138_p2), 25600   ;;  %p2771_p3 = scmp.lt.s32.totalorder (!%p138_p2), %s2551_s13, 1  ;;  %v2732_v0 = vmov (!%p138_p2), 0.0   ;;  %s2733_s22 = smov (!%p138_p2), 4   ;;  %vm516_vm2 = vcmask (!%p138_p2), 64544  }
   0x6   : > { %141 = sbr.rel (%p138_p2) target bundleno = 1030 (0x406), region = 32  ;;  %172 = vst.msk [vmem:[#allocation2] sm:$0xff] (!%p138_p2), %vm171_vm0, %v2732_v0  ;;  %173 = vst.msk [vmem:[#allocation2 + $0x8] sm:$0xff] (!%p138_p2), %vm171_vm0, %v2732_v0  ;;  %s2734_s23 = smov (!%p138_p2), 8   ;;  %vm709_vm3 = vcmask (!%p138_p2), 97344   ;;  %vm2042_vm4 = vcmask (!%p138_p2), 1043456  }
   0x7   : > { %176 = vst.msk [vmem:[#allocation2 + $0x18] sm:$0xff] (!%p138_p2), %vm171_vm0, %v2732_v0  ;;  %177 = vst.msk [vmem:[#allocation2 + $0x20] sm:$0xff] (!%p138_p2), %vm171_vm0, %v2732_v0  ;;  %s2735_s24 = smov (!%p138_p2), 12   ;;  %s2736_s25 = smov (!%p138_p2), 16   ;;  %vm902_vm5 = vcmask (!%p138_p2), 130144   ;;  %vm1095_vm6 = vcmask (!%p138_p2), 162944  }
   0x8   : > { %179 = vst.msk [vmem:[#allocation2 + $0x30] sm:$0xff] (!%p138_p2), %vm171_vm0, %v2732_v0  ;;  %180 = vst.msk [vmem:[#allocation2 + $0x38] sm:$0xff] (!%p138_p2), %vm171_vm0, %v2732_v0  ;;  %s2737_s26 = smov (!%p138_p2), 20   ;;  %s2738_s27 = smov (!%p138_p2), 24   ;;  %vm1288_vm7 = vcmask (!%p138_p2), 195744   ;;  %vm1482_vm8 = vcmask (!%p138_p2), 228544  }
   0x9   : > { %182 = vst.msk [vmem:[#allocation2 + $0x48] sm:$0xff] (!%p138_p2), %vm171_vm0, %v2732_v0  ;;  %183 = vst.msk [vmem:[#allocation2 + $0x50] sm:$0xff] (!%p138_p2), %vm171_vm0, %v2732_v0  ;;  %s2739_s28 = smov (!%p138_p2), 28   ;;  %s2740_s10 = smov (!%p138_p2), 32   ;;  %vm1675_vm9 = vcmask (!%p138_p2), 261344   ;;  %vm1868_vm10 = vcmask (!%p138_p2), 294144  }
   0xa   : > { %185 = vst.msk [vmem:[#allocation2 + $0x60] sm:$0xff] (!%p138_p2), %vm171_vm0, %v2732_v0  ;;  %186 = vst.msk [vmem:[#allocation2 + $0x68] sm:$0xff] (!%p138_p2), %vm171_vm0, %v2732_v0  ;;  %vm1945_vm11 = vcmask (!%p138_p2), 293888   ;;  %vm2463_vm12 = vcmask (!%p138_p2), 97312  }
   0xb   : > { %188 = vst.msk [vmem:[#allocation2 + $0x78] sm:$0xff] (!%p138_p2), %vm171_vm0, %v2732_v0  ;;  %189 = vst.msk [vmem:[#allocation2 + $0x80] sm:$0xff] (!%p138_p2), %vm171_vm0, %v2732_v0 }
   0xc   : > { %191 = vst.msk [vmem:[#allocation2 + $0x90] sm:$0xff] (!%p138_p2), %vm171_vm0, %v2732_v0  ;;  %192 = vst.msk [vmem:[#allocation2 + $0x98] sm:$0xff] (!%p138_p2), %vm171_vm0, %v2732_v0 }
   0xd   : > { %194 = vst.msk [vmem:[#allocation2 + $0xa8] sm:$0xff] %vm171_vm0, %v2732_v0  ;;  %195 = vst.msk [vmem:[#allocation2 + $0xb0] sm:$0xff] %vm171_vm0, %v2732_v0  ;;  %s3981_s13 = smov (!%p2771_p3, %s2551_s13), 1  ;;  %v356_v7 = vld [vmem:[#allocation2 + $0x1] sm:$0xff] }
   0xe   : > { %197 = vst.msk [vmem:[#allocation2 + $0xc0] sm:$0xff] %vm171_vm0, %v2732_v0  ;;  %198 = vst.msk [vmem:[#allocation2 + $0xc8] sm:$0xff] %vm171_vm0, %v2732_v0  ;;  %s2596_s15 = sshll.u32 %s3981_s13, 8  ;;  %420 = vrot.lane.b32.xlu0 %v356_v7, %s2733_s22  ;;  %v292_v45 = vld [vmem:[#allocation2] sm:$0xff]  ;;  %v293_v46 = vld [vmem:[#allocation2 + $0x8] sm:$0xff] }
   0xf   : > { %200 = vst.msk [vmem:[#allocation2 + $0xd8] sm:$0xff] %vm171_vm0, %v2732_v0  ;;  %201 = vst.msk [vmem:[#allocation2 + $0xe0] sm:$0xff] %vm171_vm0, %v2732_v0  ;;  %s2836_s18 = scalar_lea.vmem %s3975_s0, %s2596_s15  ;;  %s2841_s21 = scalar_lea.vmem %s3978_s3, %s2596_s15 }
  0x10   : > { %203 = vst.msk [vmem:[#allocation2 + $0xf0] sm:$0xff] %vm171_vm0, %v2732_v0  ;;  %204 = vst.msk [vmem:[#allocation2 + $0xf8] sm:$0xff] %vm171_vm0, %v2732_v0  ;;  %v227_v1 = vld [vmem:[%s2836_s18] sm:$0xff]  ;;  %v229_v2 = vld [vmem:[%s2836_s18 + $0x10] sm:$0xff] }
  0x11   : > { %206 = vst.msk [vmem:[#allocation2 + $0x108] sm:$0xff] %vm171_vm0, %v2732_v0  ;;  %207 = vst.msk [vmem:[#allocation2 + $0x110] sm:$0xff] %vm171_vm0, %v2732_v0  ;;  %v228_v3 = vld [vmem:[%s2836_s18 + $0x8] sm:$0xff]  ;;  %v231_v4 = vld [vmem:[%s2836_s18 + $0x20] sm:$0xff] }
  0x12   : > { %209 = vst.msk [vmem:[#allocation2 + $0x120] sm:$0xff] %vm171_vm0, %v2732_v0  ;;  %210 = vst.msk [vmem:[#allocation2 + $0x128] sm:$0xff] %vm171_vm0, %v2732_v0  ;;  %v230_v5 = vld [vmem:[%s2836_s18 + $0x18] sm:$0xff]  ;;  %v233_v6 = vld [vmem:[%s2836_s18 + $0x30] sm:$0xff] }
  0x13   : > { %212 = vst.msk [vmem:[#allocation2 + $0x138] sm:$0xff] %vm171_vm0, %v2732_v0  ;;  %213 = vst.msk [vmem:[#allocation2 + $0x140] sm:$0xff] %vm171_vm0, %v2732_v0  ;;  %v232_v9 = vld [vmem:[%s2836_s18 + $0x28] sm:$0xff]  ;;  %v235_v10 = vld [vmem:[%s2836_s18 + $0x40] sm:$0xff] }
  0x14   : > { %215 = vst.msk [vmem:[#allocation2 + $0x150] sm:$0xff] %vm171_vm0, %v2732_v0  ;;  %216 = vst.msk [vmem:[#allocation2 + $0x158] sm:$0xff] %vm171_vm0, %v2732_v0  ;;  %v234_v11 = vld [vmem:[%s2836_s18 + $0x38] sm:$0xff]  ;;  %v237_v12 = vld [vmem:[%s2836_s18 + $0x50] sm:$0xff] }
  0x15   : > { %218 = vst.msk [vmem:[#allocation2 + $0x168] sm:$0xff] %vm171_vm0, %v2732_v0  ;;  %219 = vst.msk [vmem:[#allocation2 + $0x170] sm:$0xff] %vm171_vm0, %v2732_v0  ;;  %v236_v13 = vld [vmem:[%s2836_s18 + $0x48] sm:$0xff]  ;;  %v239_v14 = vld [vmem:[%s2836_s18 + $0x60] sm:$0xff] }
  0x16   : > { %221 = vst.msk [vmem:[#allocation2 + $0x180] sm:$0xff] %vm171_vm0, %v2732_v0  ;;  %222 = vst.msk [vmem:[#allocation2 + $0x188] sm:$0xff] %vm171_vm0, %v2732_v0  ;;  %v238_v15 = vld [vmem:[%s2836_s18 + $0x58] sm:$0xff]  ;;  %v241_v16 = vld [vmem:[%s2836_s18 + $0x70] sm:$0xff] }
  0x17   : > { %224 = vst.msk [vmem:[#allocation2 + $0x198] sm:$0xff] %vm171_vm0, %v2732_v0  ;;  %225 = vst.msk [vmem:[#allocation2 + $0x1a0] sm:$0xff] %vm171_vm0, %v2732_v0  ;;  %v240_v17 = vld [vmem:[%s2836_s18 + $0x68] sm:$0xff]  ;;  %v243_v18 = vld [vmem:[%s2836_s18 + $0x80] sm:$0xff] }
  0x18   : > { %175 = vst.msk [vmem:[#allocation2 + $0x10] sm:$0x3] %vm174_vm1, %v2732_v0  ;;  %178 = vst.msk [vmem:[#allocation2 + $0x28] sm:$0x3] %vm174_vm1, %v2732_v0  ;;  %v242_v19 = vld [vmem:[%s2836_s18 + $0x78] sm:$0xff]  ;;  %v245_v20 = vld [vmem:[%s2836_s18 + $0x90] sm:$0xff] }
  0x19   : > { %181 = vst.msk [vmem:[#allocation2 + $0x40] sm:$0x3] %vm174_vm1, %v2732_v0  ;;  %184 = vst.msk [vmem:[#allocation2 + $0x58] sm:$0x3] %vm174_vm1, %v2732_v0  ;;  %v244_v21 = vld [vmem:[%s2836_s18 + $0x88] sm:$0xff]  ;;  %v247_v22 = vld [vmem:[%s2836_s18 + $0xa0] sm:$0xff] }
  0x1a   : > { %187 = vst.msk [vmem:[#allocation2 + $0x70] sm:$0x3] %vm174_vm1, %v2732_v0  ;;  %190 = vst.msk [vmem:[#allocation2 + $0x88] sm:$0x3] %vm174_vm1, %v2732_v0  ;;  %v246_v23 = vld [vmem:[%s2836_s18 + $0x98] sm:$0xff]  ;;  %v249_v24 = vld [vmem:[%s2836_s18 + $0xb0] sm:$0xff] }
  0x1b   : > { %193 = vst.msk [vmem:[#allocation2 + $0xa0] sm:$0x3] %vm174_vm1, %v2732_v0  ;;  %196 = vst.msk [vmem:[#allocation2 + $0xb8] sm:$0x3] %vm174_vm1, %v2732_v0  ;;  %v248_v28 = vld [vmem:[%s2836_s18 + $0xa8] sm:$0xff]  ;;  %v251_v29 = vld [vmem:[%s2836_s18 + $0xc0] sm:$0xff] }
  0x1c   : > { %199 = vst.msk [vmem:[#allocation2 + $0xd0] sm:$0x3] %vm174_vm1, %v2732_v0  ;;  %202 = vst.msk [vmem:[#allocation2 + $0xe8] sm:$0x3] %vm174_vm1, %v2732_v0  ;;  %v250_v33 = vld [vmem:[%s2836_s18 + $0xb8] sm:$0xff]  ;;  %v253_v34 = vld [vmem:[%s2836_s18 + $0xd0] sm:$0xff] }
  0x1d   : > { %205 = vst.msk [vmem:[#allocation2 + $0x100] sm:$0x3] %vm174_vm1, %v2732_v0  ;;  %208 = vst.msk [vmem:[#allocation2 + $0x118] sm:$0x3] %vm174_vm1, %v2732_v0  ;;  %v252_v35 = vld [vmem:[%s2836_s18 + $0xc8] sm:$0xff]  ;;  %v255_v36 = vld [vmem:[%s2836_s18 + $0xe0] sm:$0xff] }
  0x1e   : > { %211 = vst.msk [vmem:[#allocation2 + $0x130] sm:$0x3] %vm174_vm1, %v2732_v0  ;;  %214 = vst.msk [vmem:[#allocation2 + $0x148] sm:$0x3] %vm174_vm1, %v2732_v0  ;;  %v254_v37 = vld [vmem:[%s2836_s18 + $0xd8] sm:$0xff]  ;;  %v256_v39 = vld [vmem:[%s2836_s18 + $0xe8] sm:$0xff] }
  0x1f   : > { %217 = vst.msk [vmem:[#allocation2 + $0x160] sm:$0x3] %vm174_vm1, %v2732_v0  ;;  %220 = vst.msk [vmem:[#allocation2 + $0x178] sm:$0x3] %vm174_vm1, %v2732_v0  ;;  %v357_v8 = vld [vmem:[#allocation2 + $0x9] sm:$0xff] }
  0x20   : > { %223 = vst.msk [vmem:[#allocation2 + $0x190] sm:$0x3] %vm174_vm1, %v2732_v0  ;;  %226 = vst.msk [vmem:[#allocation2 + $0x1a8] sm:$0x3] %vm174_vm1, %v2732_v0  ;;  %422 = vrot.lane.b32.xlu0 %v357_v8, %s2733_s22 }
  0x21   : > { %260 = vst.msk [vmem:[#allocation2 + $0x19] sm:$0xff] %vm171_vm0, %v227_v1  ;;  %2303 = vst.msk [vmem:[%s2841_s21] sm:$0xff] %vm171_vm0, %v227_v1 }
  0x22   : > { %262 = vst.msk [vmem:[#allocation2 + $0x31] sm:$0xff] %vm171_vm0, %v229_v2  ;;  %2305 = vst.msk [vmem:[%s2841_s21 + $0x10] sm:$0xff] %vm171_vm0, %v229_v2 }
  0x23   : > { %261 = vst.msk [vmem:[#allocation2 + $0x21] sm:$0xff] %vm171_vm0, %v228_v3  ;;  %2304 = vst.msk [vmem:[%s2841_s21 + $0x8] sm:$0xff] %vm171_vm0, %v228_v3 }
  0x24   : > { %264 = vst.msk [vmem:[#allocation2 + $0x49] sm:$0xff] %vm171_vm0, %v231_v4  ;;  %2307 = vst.msk [vmem:[%s2841_s21 + $0x20] sm:$0xff] %vm171_vm0, %v231_v4 }
  0x25   : > { %263 = vst.msk [vmem:[#allocation2 + $0x39] sm:$0xff] %vm171_vm0, %v230_v5  ;;  %2306 = vst.msk [vmem:[%s2841_s21 + $0x18] sm:$0xff] %vm171_vm0, %v230_v5 }
  0x26   : > { %266 = vst.msk [vmem:[#allocation2 + $0x61] sm:$0xff] %vm171_vm0, %v233_v6  ;;  %2309 = vst.msk [vmem:[%s2841_s21 + $0x30] sm:$0xff] %vm171_vm0, %v233_v6 }
  0x27   : > { %265 = vst.msk [vmem:[#allocation2 + $0x51] sm:$0xff] %vm171_vm0, %v232_v9  ;;  %2308 = vst.msk [vmem:[%s2841_s21 + $0x28] sm:$0xff] %vm171_vm0, %v232_v9 }
  0x28   : > { %268 = vst.msk [vmem:[#allocation2 + $0x79] sm:$0xff] %vm171_vm0, %v235_v10  ;;  %2311 = vst.msk [vmem:[%s2841_s21 + $0x40] sm:$0xff] %vm171_vm0, %v235_v10  ;;  %v2924_v25 = vld [vmem:[#allocation2 + $0x19] sm:$0xff] }
  0x29   : > { %267 = vst.msk [vmem:[#allocation2 + $0x69] sm:$0xff] %vm171_vm0, %v234_v11  ;;  %2310 = vst.msk [vmem:[%s2841_s21 + $0x38] sm:$0xff] %vm171_vm0, %v234_v11  ;;  %v2926_v26 = vld [vmem:[#allocation2 + $0x31] sm:$0xff]  ;;  %424 = vrot.lane.b32.xlu1 %v2924_v25, %s2733_s22 }
  0x2a   : > { %270 = vst.msk [vmem:[#allocation2 + $0x91] sm:$0xff] %vm171_vm0, %v237_v12  ;;  %2313 = vst.msk [vmem:[%s2841_s21 + $0x50] sm:$0xff] %vm171_vm0, %v237_v12  ;;  %v2939_v27 = vld [vmem:[#allocation2 + $0x21] sm:$0xff]  ;;  %428 = vrot.lane.b32.xlu0 %v2926_v26, %s2733_s22  ;;  %v2993_v48 = vld [vmem:[#allocation2 + $0x18] sm:$0xff] }
  0x2b   : > { %269 = vst.msk [vmem:[#allocation2 + $0x81] sm:$0xff] %vm171_vm0, %v236_v13  ;;  %2312 = vst.msk [vmem:[%s2841_s21 + $0x48] sm:$0xff] %vm171_vm0, %v236_v13  ;;  %v2951_v30 = vld [vmem:[#allocation2 + $0x49] sm:$0xff]  ;;  %v3002_v51 = vld [vmem:[#allocation2 + $0x20] sm:$0xff] }
  0x2c   : > { %272 = vst.msk [vmem:[#allocation2 + $0xa9] sm:$0xff] %vm171_vm0, %v239_v14  ;;  %2315 = vst.msk [vmem:[%s2841_s21 + $0x60] sm:$0xff] %vm171_vm0, %v239_v14  ;;  %v2955_v31 = vld [vmem:[#allocation2 + $0x39] sm:$0xff]  ;;  %v2998_v49 = vld [vmem:[#allocation2 + $0x30] sm:$0xff] }
  0x2d   : > { %271 = vst.msk [vmem:[#allocation2 + $0x99] sm:$0xff] %vm171_vm0, %v238_v15  ;;  %2314 = vst.msk [vmem:[%s2841_s21 + $0x58] sm:$0xff] %vm171_vm0, %v238_v15  ;;  %426 = vrot.lane.b32.xlu1 %v2939_v27, %s2733_s22  ;;  %v364_v32 = vld [vmem:[#allocation2 + $0x61] sm:$0xff]  ;;  %v3011_v54 = vld [vmem:[#allocation2 + $0x38] sm:$0xff] }
  0x2e   : > { %274 = vst.msk [vmem:[#allocation2 + $0xc1] sm:$0xff] %vm171_vm0, %v241_v16  ;;  %2317 = vst.msk [vmem:[%s2841_s21 + $0x70] sm:$0xff] %vm171_vm0, %v241_v16  ;;  %432 = vrot.lane.b32.xlu0 %v2951_v30, %s2733_s22  ;;  %v363_v38 = vld [vmem:[#allocation2 + $0x51] sm:$0xff]  ;;  %v3004_v52 = vld [vmem:[#allocation2 + $0x48] sm:$0xff] }
  0x2f   : > { %273 = vst.msk [vmem:[#allocation2 + $0xb1] sm:$0xff] %vm171_vm0, %v240_v17  ;;  %2316 = vst.msk [vmem:[%s2841_s21 + $0x68] sm:$0xff] %vm171_vm0, %v240_v17  ;;  %v366_v40 = vld [vmem:[#allocation2 + $0x79] sm:$0xff]  ;;  %v3021_v57 = vld [vmem:[#allocation2 + $0x50] sm:$0xff] }
  0x30   : > { %276 = vst.msk [vmem:[#allocation2 + $0xd9] sm:$0xff] %vm171_vm0, %v243_v18  ;;  %2319 = vst.msk [vmem:[%s2841_s21 + $0x80] sm:$0xff] %vm171_vm0, %v243_v18  ;;  %v365_v41 = vld [vmem:[#allocation2 + $0x69] sm:$0xff]  ;;  %v3013_v55 = vld [vmem:[#allocation2 + $0x60] sm:$0xff] }
  0x31   : > { %275 = vst.msk [vmem:[#allocation2 + $0xc9] sm:$0xff] %vm171_vm0, %v242_v19  ;;  %2318 = vst.msk [vmem:[%s2841_s21 + $0x78] sm:$0xff] %vm171_vm0, %v242_v19  ;;  %430 = vrot.lane.b32.xlu1 %v2955_v31, %s2733_s22  ;;  %v368_v42 = vld [vmem:[#allocation2 + $0x91] sm:$0xff]  ;;  %v3025_v59 = vld [vmem:[#allocation2 + $0x68] sm:$0xff] }
  0x32   : > { %278 = vst.msk [vmem:[#allocation2 + $0xf1] sm:$0xff] %vm171_vm0, %v245_v20  ;;  %2321 = vst.msk [vmem:[%s2841_s21 + $0x90] sm:$0xff] %vm171_vm0, %v245_v20  ;;  %436 = vrot.lane.b32.xlu0 %v364_v32, %s2733_s22  ;;  %v367_v43 = vld [vmem:[#allocation2 + $0x81] sm:$0xff]  ;;  %v3023_v58 = vld [vmem:[#allocation2 + $0x78] sm:$0xff] }
  0x33   : > { %277 = vst.msk [vmem:[#allocation2 + $0xe1] sm:$0xff] %vm171_vm0, %v244_v21  ;;  %2320 = vst.msk [vmem:[%s2841_s21 + $0x88] sm:$0xff] %vm171_vm0, %v244_v21  ;;  %v370_v44 = vld [vmem:[#allocation2 + $0xa9] sm:$0xff]  ;;  %v3036_v61 = vld [vmem:[#allocation2 + $0x80] sm:$0xff] }
  0x34   : > { %280 = vst.msk [vmem:[#allocation2 + $0x109] sm:$0xff] %vm171_vm0, %v247_v22  ;;  %2323 = vst.msk [vmem:[%s2841_s21 + $0xa0] sm:$0xff] %vm171_vm0, %v247_v22  ;;  %v369_v47 = vld [vmem:[#allocation2 + $0x99] sm:$0xff]  ;;  %v3034_v60 = vld [vmem:[#allocation2 + $0x90] sm:$0xff] }
  0x35   : > { %279 = vst.msk [vmem:[#allocation2 + $0xf9] sm:$0xff] %vm171_vm0, %v246_v23  ;;  %2322 = vst.msk [vmem:[%s2841_s21 + $0x98] sm:$0xff] %vm171_vm0, %v246_v23  ;;  %434 = vrot.lane.b32.xlu1 %v363_v38, %s2733_s22  ;;  %v372_v50 = vld [vmem:[#allocation2 + $0xc1] sm:$0xff]  ;;  %v3046_v0 = vld [vmem:[#allocation2 + $0x98] sm:$0xff] }
  0x36   : > { %282 = vst.msk [vmem:[#allocation2 + $0x121] sm:$0xff] %vm171_vm0, %v249_v24  ;;  %2325 = vst.msk [vmem:[%s2841_s21 + $0xb0] sm:$0xff] %vm171_vm0, %v249_v24  ;;  %440 = vrot.lane.b32.xlu0 %v366_v40, %s2733_s22  ;;  %v371_v53 = vld [vmem:[#allocation2 + $0xb1] sm:$0xff]  ;;  %v3038_v62 = vld [vmem:[#allocation2 + $0xa8] sm:$0xff] }
  0x37   : > { %281 = vst.msk [vmem:[#allocation2 + $0x111] sm:$0xff] %vm171_vm0, %v248_v28  ;;  %2324 = vst.msk [vmem:[%s2841_s21 + $0xa8] sm:$0xff] %vm171_vm0, %v248_v28  ;;  %v3015_v56 = vld [vmem:[#allocation2 + $0xd9] sm:$0xff]  ;;  %v3050_v2 = vld [vmem:[#allocation2 + $0xb0] sm:$0xff] }
  0x38   : > { %284 = vst.msk [vmem:[#allocation2 + $0x139] sm:$0xff] %vm171_vm0, %v251_v29  ;;  %2327 = vst.msk [vmem:[%s2841_s21 + $0xc0] sm:$0xff] %vm171_vm0, %v251_v29  ;;  %v373_v63 = vld [vmem:[#allocation2 + $0xc9] sm:$0xff]  ;;  %v3048_v1 = vld [vmem:[#allocation2 + $0xc0] sm:$0xff] }
  0x39   : > { %283 = vst.msk [vmem:[#allocation2 + $0x129] sm:$0xff] %vm171_vm0, %v250_v33  ;;  %2326 = vst.msk [vmem:[%s2841_s21 + $0xb8] sm:$0xff] %vm171_vm0, %v250_v33  ;;  %438 = vrot.lane.b32.xlu1 %v365_v41, %s2733_s22  ;;  %v3059_v3 = vld [vmem:[#allocation2 + $0xd8] sm:$0xff]  ;;  %v3061_v4 = vld [vmem:[#allocation2 + $0xc8] sm:$0xff] }
  0x3a   : > { %286 = vst.msk [vmem:[#allocation2 + $0x151] sm:$0xff] %vm171_vm0, %v253_v34  ;;  %2329 = vst.msk [vmem:[%s2841_s21 + $0xd0] sm:$0xff] %vm171_vm0, %v253_v34  ;;  %444 = vrot.lane.b32.xlu0 %v368_v42, %s2733_s22  ;;  %v3063_v5 = vld [vmem:[#allocation2 + $0xf0] sm:$0xff]  ;;  %v3071_v6 = vld [vmem:[#allocation2 + $0xe0] sm:$0xff] }
  0x3b   : > { %285 = vst.msk [vmem:[#allocation2 + $0x141] sm:$0xff] %vm171_vm0, %v252_v35  ;;  %2328 = vst.msk [vmem:[%s2841_s21 + $0xc8] sm:$0xff] %vm171_vm0, %v252_v35  ;;  %v3073_v7 = vld [vmem:[#allocation2 + $0x108] sm:$0xff]  ;;  %v3089_v11 = vld [vmem:[#allocation2 + $0xf1] sm:$0xff] }
  0x3c   : > { %288 = vst.msk [vmem:[#allocation2 + $0x169] sm:$0xff] %vm171_vm0, %v255_v36  ;;  %2331 = vst.msk [vmem:[%s2841_s21 + $0xe0] sm:$0xff] %vm171_vm0, %v255_v36  ;;  %v3075_v8 = vld [vmem:[#allocation2 + $0xf8] sm:$0xff]  ;;  %v3100_v13 = vld [vmem:[#allocation2 + $0xe1] sm:$0xff] }
  0x3d   : > { %287 = vst.msk [vmem:[#allocation2 + $0x159] sm:$0xff] %vm171_vm0, %v254_v37  ;;  %2330 = vst.msk [vmem:[%s2841_s21 + $0xd8] sm:$0xff] %vm171_vm0, %v254_v37  ;;  %442 = vrot.lane.b32.xlu1 %v367_v43, %s2733_s22  ;;  %v3085_v9 = vld [vmem:[#allocation2 + $0x120] sm:$0xff]  ;;  %v3106_v15 = vld [vmem:[#allocation2 + $0x109] sm:$0xff] }
  0x3e   : > { %289 = vst.msk [vmem:[#allocation2 + $0x171] sm:$0xff] %vm171_vm0, %v256_v39  ;;  %2332 = vst.msk [vmem:[%s2841_s21 + $0xe8] sm:$0xff] %vm171_vm0, %v256_v39  ;;  %448 = vrot.lane.b32.xlu0 %v370_v44, %s2733_s22  ;;  %v3087_v10 = vld [vmem:[#allocation2 + $0x110] sm:$0xff]  ;;  %v3116_v17 = vld [vmem:[#allocation2 + $0xf9] sm:$0xff] }
  0x3f   : > { %324 = vst.msk [vmem:[#allocation3] sm:$0xff] %vm171_vm0, %v292_v45  ;;  %325 = vst.msk [vmem:[#allocation3 + $0x8] sm:$0xff] %vm171_vm0, %v293_v46  ;;  %v3095_v12 = vld [vmem:[#allocation2 + $0x138] sm:$0xff]  ;;  %v380_v19 = vld [vmem:[#allocation2 + $0x121] sm:$0xff] }
  0x40   : > { %326 = vst.msk [vmem:[#allocation3 + $0x10] sm:$0xff] %vm171_vm0, %v2993_v48  ;;  %328 = vst.msk [vmem:[#allocation3 + $0x20] sm:$0xff] %vm171_vm0, %v2998_v49  ;;  %v3104_v14 = vld [vmem:[#allocation2 + $0x128] sm:$0xff]  ;;  %v379_v21 = vld [vmem:[#allocation2 + $0x111] sm:$0xff] }
  0x41   : > { %446 = vrot.lane.b32.xlu1 %v369_v47, %s2733_s22  ;;  %327 = vst.msk [vmem:[#allocation3 + $0x18] sm:$0xff] %vm171_vm0, %v3002_v51  ;;  %330 = vst.msk [vmem:[#allocation3 + $0x30] sm:$0xff] %vm171_vm0, %v3004_v52  ;;  %v3110_v16 = vld [vmem:[#allocation2 + $0x150] sm:$0xff]  ;;  %v382_v23 = vld [vmem:[#allocation2 + $0x139] sm:$0xff] }
  0x42   : > { %329 = vst.msk [vmem:[#allocation3 + $0x28] sm:$0xff] %vm171_vm0, %v3011_v54  ;;  %332 = vst.msk [vmem:[#allocation3 + $0x40] sm:$0xff] %vm171_vm0, %v3013_v55  ;;  %452 = vrot.lane.b32.xlu0 %v372_v50, %s2733_s22  ;;  %v3120_v18 = vld [vmem:[#allocation2 + $0x140] sm:$0xff]  ;;  %v381_v24 = vld [vmem:[#allocation2 + $0x129] sm:$0xff] }
  0x43   : > { %331 = vst.msk [vmem:[#allocation3 + $0x38] sm:$0xff] %vm171_vm0, %v3021_v57  ;;  %334 = vst.msk [vmem:[#allocation3 + $0x50] sm:$0xff] %vm171_vm0, %v3023_v58  ;;  %v3124_v20 = vld [vmem:[#allocation2 + $0x168] sm:$0xff]  ;;  %v257_v28 = vld [vmem:[%s2836_s18 + $0xf0] sm:$0xff] }
  0x44   : > { %333 = vst.msk [vmem:[#allocation3 + $0x48] sm:$0xff] %vm171_vm0, %v3025_v59  ;;  %336 = vst.msk [vmem:[#allocation3 + $0x60] sm:$0xff] %vm171_vm0, %v3034_v60  ;;  %v3131_v22 = vld [vmem:[#allocation2 + $0x158] sm:$0xff]  ;;  %v383_v33 = vld [vmem:[#allocation2 + $0x141] sm:$0xff] }
  0x45   : > { %335 = vst.msk [vmem:[#allocation3 + $0x58] sm:$0xff] %vm171_vm0, %v3036_v61  ;;  %338 = vst.msk [vmem:[#allocation3 + $0x70] sm:$0xff] %vm171_vm0, %v3038_v62  ;;  %450 = vrot.lane.b32.xlu1 %v371_v53, %s2733_s22  ;;  %v3138_v29 = vld [vmem:[#allocation2 + $0x170] sm:$0xff]  ;;  %v258_v35 = vld [vmem:[%s2836_s18 + $0xf8] sm:$0xff] }
  0x46   : > { %337 = vst.msk [vmem:[#allocation3 + $0x68] sm:$0xff] %vm171_vm0, %v3046_v0  ;;  %340 = vst.msk [vmem:[#allocation3 + $0x80] sm:$0xff] %vm171_vm0, %v3048_v1  ;;  %456 = vrot.lane.b32.xlu0 %v3015_v56, %s2733_s22  ;;  %v384_v32 = vld [vmem:[#allocation2 + $0x151] sm:$0xff]  ;;  %v386_v34 = vld [vmem:[#allocation2 + $0x169] sm:$0xff] }
  0x47   : > { %339 = vst.msk [vmem:[#allocation3 + $0x78] sm:$0xff] %vm171_vm0, %v3050_v2  ;;  %342 = vst.msk [vmem:[#allocation3 + $0x90] sm:$0xff] %vm171_vm0, %v3059_v3  ;;  %v385_v36 = vld [vmem:[#allocation2 + $0x159] sm:$0xff]  ;;  %v549_v37 = vld [vmem:[#allocation2 + $0x2] sm:$0xff] }
  0x48   : > { %341 = vst.msk [vmem:[#allocation3 + $0x88] sm:$0xff] %vm171_vm0, %v3061_v4  ;;  %344 = vst.msk [vmem:[#allocation3 + $0xa0] sm:$0xff] %vm171_vm0, %v3063_v5  ;;  %v387_v38 = vld [vmem:[#allocation2 + $0x171] sm:$0xff]  ;;  %v3155_v39 = vld [vmem:[#allocation2 + $0x1a] sm:$0xff] }
  0x49   : > { %343 = vst.msk [vmem:[#allocation3 + $0x98] sm:$0xff] %vm171_vm0, %v3071_v6  ;;  %346 = vst.msk [vmem:[#allocation3 + $0xb0] sm:$0xff] %vm171_vm0, %v3073_v7  ;;  %454 = vrot.lane.b32.xlu1 %v373_v63, %s2733_s22  ;;  %v550_v40 = vld [vmem:[#allocation2 + $0xa] sm:$0xff]  ;;  %v3160_v41 = vld [vmem:[#allocation2 + $0x32] sm:$0xff] }
  0x4a   : > { %345 = vst.msk [vmem:[#allocation3 + $0xa8] sm:$0xff] %vm171_vm0, %v3075_v8  ;;  %348 = vst.msk [vmem:[#allocation3 + $0xc0] sm:$0xff] %vm171_vm0, %v3085_v9  ;;  %460 = vrot.lane.b32.xlu0 %v3089_v11, %s2733_s22  ;;  %v3163_v42 = vld [vmem:[#allocation2 + $0x22] sm:$0xff]  ;;  %v3167_v43 = vld [vmem:[#allocation2 + $0x4a] sm:$0xff] }
  0x4b   : > { %347 = vst.msk [vmem:[#allocation3 + $0xb8] sm:$0xff] %vm171_vm0, %v3087_v10  ;;  %350 = vst.msk [vmem:[#allocation3 + $0xd0] sm:$0xff] %vm171_vm0, %v3095_v12  ;;  %v3171_v44 = vld [vmem:[#allocation2 + $0x3a] sm:$0xff]  ;;  %v3175_v45 = vld [vmem:[#allocation2 + $0x62] sm:$0xff] }
  0x4c   : > { %349 = vst.msk [vmem:[#allocation3 + $0xc8] sm:$0xff] %vm171_vm0, %v3104_v14  ;;  %352 = vst.msk [vmem:[#allocation3 + $0xe0] sm:$0xff] %vm171_vm0, %v3110_v16  ;;  %v3179_v46 = vld [vmem:[#allocation2 + $0x52] sm:$0xff]  ;;  %v559_v47 = vld [vmem:[#allocation2 + $0x7a] sm:$0xff] }
  0x4d   : > { %458 = vrot.lane.b32.xlu1 %v3100_v13, %s2733_s22  ;;  %351 = vst.msk [vmem:[#allocation3 + $0xd8] sm:$0xff] %vm171_vm0, %v3120_v18  ;;  %354 = vst.msk [vmem:[#allocation3 + $0xf0] sm:$0xff] %vm171_vm0, %v3124_v20  ;;  %v3185_v50 = vld [vmem:[#allocation2 + $0x6a] sm:$0xff]  ;;  %v561_v53 = vld [vmem:[#allocation2 + $0x92] sm:$0xff] }
  0x4e   : > { %464 = vrot.lane.b32.xlu0 %v3106_v15, %s2733_s22  ;;  %353 = vst.msk [vmem:[#allocation3 + $0xe8] sm:$0xff] %vm171_vm0, %v3131_v22  ;;  %290 = vst.msk [vmem:[#allocation2 + $0x181] sm:$0xff] %vm171_vm0, %v257_v28  ;;  %v560_v63 = vld [vmem:[#allocation2 + $0x82] sm:$0xff] }
  0x4f   : > { %2333 = vst.msk [vmem:[%s2841_s21 + $0xf0] sm:$0xff] %vm171_vm0, %v257_v28  ;;  %355 = vst.msk [vmem:[#allocation3 + $0xf8] sm:$0xff] %vm171_vm0, %v3138_v29  ;;  %v3195_v28 = vld [vmem:[#allocation2 + $0xda] sm:$0xff] }
  0x50   : > { %291 = vst.msk [vmem:[#allocation2 + $0x189] sm:$0xff] %vm171_vm0, %v258_v35  ;;  %2334 = vst.msk [vmem:[%s2841_s21 + $0xf8] sm:$0xff] %vm171_vm0, %v258_v35  ;;  %v3207_v35 = vld [vmem:[#allocation2 + $0x10a] sm:$0xff] }
  0x51   : > { %462 = vrot.lane.b32.xlu1 %v3116_v17, %s2733_s22 }
  0x52   : > { %468 = vrot.lane.b32.xlu0 %v380_v19, %s2733_s22  ;;  %v563_v19 = vld [vmem:[#allocation2 + $0xaa] sm:$0xff] }
  0x55   : > { %466 = vrot.lane.b32.xlu1 %v379_v21, %s2733_s22  ;;  %v562_v21 = vld [vmem:[#allocation2 + $0x9a] sm:$0xff] }
  0x56   : > { %472 = vrot.lane.b32.xlu0 %v382_v23, %s2733_s22  ;;  %v565_v23 = vld [vmem:[#allocation2 + $0xc2] sm:$0xff] }
  0x59   : > { %470 = vrot.lane.b32.xlu1 %v381_v24, %s2733_s22  ;;  %v564_v24 = vld [vmem:[#allocation2 + $0xb2] sm:$0xff] }
  0x5a   : > { %476 = vrot.lane.b32.xlu0 %v384_v32, %s2733_s22  ;;  %v566_v32 = vld [vmem:[#allocation2 + $0xca] sm:$0xff] }
  0x5d   : > { %474 = vrot.lane.b32.xlu1 %v383_v33, %s2733_s22  ;;  %v3200_v33 = vld [vmem:[#allocation2 + $0xf2] sm:$0xff] }
  0x5e   : > { %480 = vrot.lane.b32.xlu0 %v386_v34, %s2733_s22  ;;  %v3203_v34 = vld [vmem:[#allocation2 + $0xe2] sm:$0xff] }
  0x61   : > { %478 = vrot.lane.b32.xlu1 %v385_v36, %s2733_s22  ;;  %v3211_v36 = vld [vmem:[#allocation2 + $0xfa] sm:$0xff] }
  0x62   : > { %613 = vrot.lane.b32.xlu0 %v549_v37, %s2734_s23  ;;  %v573_v37 = vld [vmem:[#allocation2 + $0x122] sm:$0xff] }
  0x65   : > { %482 = vrot.lane.b32.xlu1 %v387_v38, %s2733_s22  ;;  %v3217_v38 = vld [vmem:[#allocation2 + $0x112] sm:$0xff] }
  0x66   : > { %617 = vrot.lane.b32.xlu0 %v3155_v39, %s2734_s23 }
  0x69   : > { %615 = vrot.lane.b32.xlu1 %v550_v40, %s2734_s23  ;;  %v575_v40 = vld [vmem:[#allocation2 + $0x13a] sm:$0xff] }
  0x6a   : > { %621 = vrot.lane.b32.xlu0 %v3160_v41, %s2734_s23 }
  0x6d   : > { %619 = vrot.lane.b32.xlu1 %v3163_v42, %s2734_s23 }
  0x6e   : > { %625 = vrot.lane.b32.xlu0 %v3167_v43, %s2734_s23 }
  0x71   : > { %623 = vrot.lane.b32.xlu1 %v3171_v44, %s2734_s23 }
  0x72   : > { %629 = vrot.lane.b32.xlu0 %v3175_v45, %s2734_s23 }
  0x75   : > { %627 = vrot.lane.b32.xlu1 %v3179_v46, %s2734_s23 }
  0x76   : > { %633 = vrot.lane.b32.xlu0 %v559_v47, %s2734_s23 }
  0x79   : > { %631 = vrot.lane.b32.xlu1 %v3185_v50, %s2734_s23 }
  0x7a   : > { %637 = vrot.lane.b32.xlu0 %v561_v53, %s2734_s23  ;;  %v574_v53 = vld [vmem:[#allocation2 + $0x12a] sm:$0xff] }
  0x7d   : > { %635 = vrot.lane.b32.xlu1 %v560_v63, %s2734_s23  ;;  %v577_v63 = vld [vmem:[#allocation2 + $0x152] sm:$0xff] }
  0x7e   : > { %641 = vrot.lane.b32.xlu0 %v563_v19, %s2734_s23 }
  0x80   : > { %v421_v47 = vpop.permute.xlu0 %420 }
  0x81   : > { %639 = vrot.lane.b32.xlu1 %v562_v21, %s2734_s23  ;;  %517 = vst.msk [vmem:[#allocation3] sm:$0xff] %vm516_vm2, %v421_v47  ;;  %v576_v21 = vld [vmem:[#allocation2 + $0x142] sm:$0xff] }
  0x82   : > { %645 = vrot.lane.b32.xlu0 %v565_v23, %s2734_s23 }
  0x85   : > { %643 = vrot.lane.b32.xlu1 %v564_v24, %s2734_s23  ;;  %v579_v24 = vld [vmem:[#allocation2 + $0x16a] sm:$0xff] }
  0x86   : > { %649 = vrot.lane.b32.xlu0 %v3195_v28, %s2734_s23 }
  0x89   : > { %647 = vrot.lane.b32.xlu1 %v566_v32, %s2734_s23 }
  0x8a   : > { %653 = vrot.lane.b32.xlu0 %v3200_v33, %s2734_s23 }
  0x8d   : > { %651 = vrot.lane.b32.xlu1 %v3203_v34, %s2734_s23 }
  0x8e   : > { %657 = vrot.lane.b32.xlu0 %v3207_v35, %s2734_s23 }
  0x91   : > { %655 = vrot.lane.b32.xlu1 %v3211_v36, %s2734_s23 }
  0x92   : > { %661 = vrot.lane.b32.xlu0 %v573_v37, %s2734_s23  ;;  %v423_v19 = vpop.permute.xlu0 %422  ;;  %v578_v37 = vld [vmem:[#allocation2 + $0x15a] sm:$0xff] }
  0x93   : > { %518 = vst.msk [vmem:[#allocation3 + $0x8] sm:$0xff] %vm516_vm2, %v423_v19 }
  0x95   : > { %659 = vrot.lane.b32.xlu1 %v3217_v38, %s2734_s23 }
  0x96   : > { %665 = vrot.lane.b32.xlu0 %v575_v40, %s2734_s23 }
  0x99   : > { %663 = vrot.lane.b32.xlu1 %v574_v53, %s2734_s23  ;;  %v580_v53 = vld [vmem:[#allocation2 + $0x172] sm:$0xff] }
  0x9a   : > { %669 = vrot.lane.b32.xlu0 %v577_v63, %s2734_s23 }
  0x9b   : > { %v425_v23 = vpop.permute.xlu1 %424 }
  0x9c   : > { %519 = vst.msk [vmem:[#allocation3 + $0x10] sm:$0xff] %vm516_vm2, %v425_v23  ;;  %v429_v32 = vpop.permute.xlu0 %428 }
  0x9d   : > { %667 = vrot.lane.b32.xlu1 %v576_v21, %s2734_s23  ;;  %521 = vst.msk [vmem:[#allocation3 + $0x20] sm:$0xff] %vm516_vm2, %v429_v32 }
  0x9e   : > { %673 = vrot.lane.b32.xlu0 %v579_v24, %s2734_s23 }
  0x9f   : > { %v427_v40 = vpop.permute.xlu1 %426 }
  0xa0   : > { %520 = vst.msk [vmem:[#allocation3 + $0x18] sm:$0xff] %vm516_vm2, %v427_v40  ;;  %v433_v47 = vpop.permute.xlu0 %432 }
  0xa1   : > { %671 = vrot.lane.b32.xlu1 %v578_v37, %s2734_s23  ;;  %523 = vst.msk [vmem:[#allocation3 + $0x30] sm:$0xff] %vm516_vm2, %v433_v47 }
  0xa2   : > { %806 = vrot.lane.b32.xlu0 %v2993_v48, %s2735_s24 }
  0xa3   : > { %v431_v63 = vpop.permute.xlu1 %430 }
  0xa4   : > { %522 = vst.msk [vmem:[#allocation3 + $0x28] sm:$0xff] %vm516_vm2, %v431_v63  ;;  %v437_v19 = vpop.permute.xlu0 %436 }
  0xa5   : > { %675 = vrot.lane.b32.xlu1 %v580_v53, %s2734_s23  ;;  %525 = vst.msk [vmem:[#allocation3 + $0x40] sm:$0xff] %vm516_vm2, %v437_v19 }
  0xa6   : > { %810 = vrot.lane.b32.xlu0 %v2998_v49, %s2735_s24 }
  0xa7   : > { %v435_v21 = vpop.permute.xlu1 %434 }
  0xa8   : > { %524 = vst.msk [vmem:[#allocation3 + $0x38] sm:$0xff] %vm516_vm2, %v435_v21  ;;  %v441_v23 = vpop.permute.xlu0 %440 }
  0xa9   : > { %808 = vrot.lane.b32.xlu1 %v3002_v51, %s2735_s24  ;;  %527 = vst.msk [vmem:[#allocation3 + $0x50] sm:$0xff] %vm516_vm2, %v441_v23 }
  0xaa   : > { %814 = vrot.lane.b32.xlu0 %v3004_v52, %s2735_s24 }
  0xab   : > { %v439_v48 = vpop.permute.xlu1 %438 }
  0xac   : > { %526 = vst.msk [vmem:[#allocation3 + $0x48] sm:$0xff] %vm516_vm2, %v439_v48  ;;  %v445_v24 = vpop.permute.xlu0 %444 }
  0xad   : > { %812 = vrot.lane.b32.xlu1 %v3011_v54, %s2735_s24  ;;  %529 = vst.msk [vmem:[#allocation3 + $0x60] sm:$0xff] %vm516_vm2, %v445_v24 }
  0xae   : > { %818 = vrot.lane.b32.xlu0 %v3013_v55, %s2735_s24 }
  0xaf   : > { %v443_v32 = vpop.permute.xlu1 %442 }
  0xb0   : > { %528 = vst.msk [vmem:[#allocation3 + $0x58] sm:$0xff] %vm516_vm2, %v443_v32  ;;  %v449_v51 = vpop.permute.xlu0 %448 }
  0xb1   : > { %816 = vrot.lane.b32.xlu1 %v3021_v57, %s2735_s24  ;;  %531 = vst.msk [vmem:[#allocation3 + $0x70] sm:$0xff] %vm516_vm2, %v449_v51 }
  0xb2   : > { %822 = vrot.lane.b32.xlu0 %v3023_v58, %s2735_s24 }
  0xb3   : > { %v447_v37 = vpop.permute.xlu1 %446 }
  0xb4   : > { %530 = vst.msk [vmem:[#allocation3 + $0x68] sm:$0xff] %vm516_vm2, %v447_v37  ;;  %v453_v40 = vpop.permute.xlu0 %452 }
  0xb5   : > { %820 = vrot.lane.b32.xlu1 %v3025_v59, %s2735_s24  ;;  %533 = vst.msk [vmem:[#allocation3 + $0x80] sm:$0xff] %vm516_vm2, %v453_v40  ;;  %v772_v40 = vld [vmem:[#allocation2 + $0x180] sm:$0xff] }
  0xb6   : > { %826 = vrot.lane.b32.xlu0 %v3034_v60, %s2735_s24 }
  0xb7   : > { %v451_v47 = vpop.permute.xlu1 %450 }
  0xb8   : > { %532 = vst.msk [vmem:[#allocation3 + $0x78] sm:$0xff] %vm516_vm2, %v451_v47  ;;  %v457_v53 = vpop.permute.xlu0 %456 }
  0xb9   : > { %824 = vrot.lane.b32.xlu1 %v3036_v61, %s2735_s24  ;;  %535 = vst.msk [vmem:[#allocation3 + $0x90] sm:$0xff] %vm516_vm2, %v457_v53 }
  0xba   : > { %830 = vrot.lane.b32.xlu0 %v3038_v62, %s2735_s24 }
  0xbb   : > { %v455_v63 = vpop.permute.xlu1 %454 }
  0xbc   : > { %534 = vst.msk [vmem:[#allocation3 + $0x88] sm:$0xff] %vm516_vm2, %v455_v63  ;;  %v461_v19 = vpop.permute.xlu0 %460 }
  0xbd   : > { %828 = vrot.lane.b32.xlu1 %v3046_v0, %s2735_s24  ;;  %537 = vst.msk [vmem:[#allocation3 + $0xa0] sm:$0xff] %vm516_vm2, %v461_v19 }
  0xbe   : > { %834 = vrot.lane.b32.xlu0 %v3048_v1, %s2735_s24 }
  0xbf   : > { %v459_v60 = vpop.permute.xlu1 %458 }
  0xc0   : > { %536 = vst.msk [vmem:[#allocation3 + $0x98] sm:$0xff] %vm516_vm2, %v459_v60  ;;  %v465_v21 = vpop.permute.xlu0 %464 }
  0xc1   : > { %832 = vrot.lane.b32.xlu1 %v3050_v2, %s2735_s24  ;;  %539 = vst.msk [vmem:[#allocation3 + $0xb0] sm:$0xff] %vm516_vm2, %v465_v21 }
  0xc2   : > { %838 = vrot.lane.b32.xlu0 %v3059_v3, %s2735_s24 }
  0xc3   : > { %v463_v62 = vpop.permute.xlu1 %462 }
  0xc4   : > { %538 = vst.msk [vmem:[#allocation3 + $0xa8] sm:$0xff] %vm516_vm2, %v463_v62  ;;  %v469_v0 = vpop.permute.xlu0 %468 }
  0xc5   : > { %836 = vrot.lane.b32.xlu1 %v3061_v4, %s2735_s24  ;;  %541 = vst.msk [vmem:[#allocation3 + $0xc0] sm:$0xff] %vm516_vm2, %v469_v0 }
  0xc6   : > { %842 = vrot.lane.b32.xlu0 %v3063_v5, %s2735_s24 }
  0xc7   : > { %v467_v1 = vpop.permute.xlu1 %466 }
  0xc8   : > { %540 = vst.msk [vmem:[#allocation3 + $0xb8] sm:$0xff] %vm516_vm2, %v467_v1  ;;  %v473_v2 = vpop.permute.xlu0 %472 }
  0xc9   : > { %840 = vrot.lane.b32.xlu1 %v3071_v6, %s2735_s24  ;;  %543 = vst.msk [vmem:[#allocation3 + $0xd0] sm:$0xff] %vm516_vm2, %v473_v2 }
  0xca   : > { %846 = vrot.lane.b32.xlu0 %v3073_v7, %s2735_s24 }
  0xcb   : > { %v471_v3 = vpop.permute.xlu1 %470 }
  0xcc   : > { %542 = vst.msk [vmem:[#allocation3 + $0xc8] sm:$0xff] %vm516_vm2, %v471_v3  ;;  %v477_v4 = vpop.permute.xlu0 %476 }
  0xcd   : > { %844 = vrot.lane.b32.xlu1 %v3075_v8, %s2735_s24  ;;  %545 = vst.msk [vmem:[#allocation3 + $0xe0] sm:$0xff] %vm516_vm2, %v477_v4  ;;  %v1935_v4 = vld [vmem:[%s3976_s1 + $0x10] sm:$0xff] }
  0xce   : > { %850 = vrot.lane.b32.xlu0 %v3085_v9, %s2735_s24 }
  0xcf   : > { %v475_v23 = vpop.permute.xlu1 %474 }
  0xd0   : > { %544 = vst.msk [vmem:[#allocation3 + $0xd8] sm:$0xff] %vm516_vm2, %v475_v23  ;;  %v481_v6 = vpop.permute.xlu0 %480  ;;  %v1936_v23 = vld [vmem:[%s3976_s1 + $0x18] sm:$0xff] }
  0xd1   : > { %848 = vrot.lane.b32.xlu1 %v3087_v10, %s2735_s24  ;;  %547 = vst.msk [vmem:[#allocation3 + $0xf0] sm:$0xff] %vm516_vm2, %v481_v6 }
  0xd2   : > { %854 = vrot.lane.b32.xlu0 %v3095_v12, %s2735_s24 }
  0xd3   : > { %v479_v48 = vpop.permute.xlu1 %478 }
  0xd4   : > { %546 = vst.msk [vmem:[#allocation3 + $0xe8] sm:$0xff] %vm516_vm2, %v479_v48  ;;  %v614_v24 = vpop.permute.xlu0 %613 }
  0xd5   : > { %852 = vrot.lane.b32.xlu1 %v3104_v14, %s2735_s24  ;;  %710 = vst.msk [vmem:[#allocation3] sm:$0xff] %vm709_vm3, %v614_v24  ;;  %v1937_v24 = vld [vmem:[%s3976_s1 + $0x20] sm:$0xf] }
  0xd6   : > { %858 = vrot.lane.b32.xlu0 %v3110_v16, %s2735_s24 }
  0xd7   : > { %v483_v32 = vpop.permute.xlu1 %482 }
  0xd8   : > { %548 = vst.msk [vmem:[#allocation3 + $0xf8] sm:$0xff] %vm516_vm2, %v483_v32  ;;  %v618_v51 = vpop.permute.xlu0 %617 }
  0xd9   : > { %856 = vrot.lane.b32.xlu1 %v3120_v18, %s2735_s24  ;;  %712 = vst.msk [vmem:[#allocation3 + $0x10] sm:$0xff] %vm709_vm3, %v618_v51 }
  0xda   : > { %862 = vrot.lane.b32.xlu0 %v3124_v20, %s2735_s24  ;;  %v773_v20 = vld [vmem:[#allocation2 + $0x188] sm:$0xff] }
  0xdb   : > { %v616_v37 = vpop.permute.xlu1 %615 }
  0xdc   : > { %711 = vst.msk [vmem:[#allocation3 + $0x8] sm:$0xff] %vm709_vm3, %v616_v37  ;;  %v622_v47 = vpop.permute.xlu0 %621 }
  0xdd   : > { %860 = vrot.lane.b32.xlu1 %v3131_v22, %s2735_s24  ;;  %714 = vst.msk [vmem:[#allocation3 + $0x20] sm:$0xff] %vm709_vm3, %v622_v47 }
  0xde   : > { %866 = vrot.lane.b32.xlu0 %v772_v40, %s2735_s24 }
  0xdf   : > { %v620_v53 = vpop.permute.xlu1 %619 }
  0xe0   : > { %713 = vst.msk [vmem:[#allocation3 + $0x18] sm:$0xff] %vm709_vm3, %v620_v53  ;;  %v626_v63 = vpop.permute.xlu0 %625 }
  0xe1   : > { %864 = vrot.lane.b32.xlu1 %v3138_v29, %s2735_s24  ;;  %716 = vst.msk [vmem:[#allocation3 + $0x30] sm:$0xff] %vm709_vm3, %v626_v63 }
  0xe2   : > { %999 = vrot.lane.b32.xlu0 %v2924_v25, %s2736_s25 }
  0xe3   : > { %v624_v19 = vpop.permute.xlu1 %623 }
  0xe4   : > { %715 = vst.msk [vmem:[#allocation3 + $0x28] sm:$0xff] %vm709_vm3, %v624_v19  ;;  %v630_v60 = vpop.permute.xlu0 %629 }
  0xe5   : > { %868 = vrot.lane.b32.xlu1 %v773_v20, %s2735_s24  ;;  %718 = vst.msk [vmem:[#allocation3 + $0x40] sm:$0xff] %vm709_vm3, %v630_v60 }
  0xe6   : > { %1003 = vrot.lane.b32.xlu0 %v2926_v26, %s2736_s25 }
  0xe7   : > { %v628_v21 = vpop.permute.xlu1 %627 }
  0xe8   : > { %717 = vst.msk [vmem:[#allocation3 + $0x38] sm:$0xff] %vm709_vm3, %v628_v21  ;;  %v634_v29 = vpop.permute.xlu0 %633 }
  0xe9   : > { %1001 = vrot.lane.b32.xlu1 %v2939_v27, %s2736_s25  ;;  %720 = vst.msk [vmem:[#allocation3 + $0x50] sm:$0xff] %vm709_vm3, %v634_v29 }
  0xea   : > { %1007 = vrot.lane.b32.xlu0 %v2951_v30, %s2736_s25 }
  0xeb   : > { %v632_v25 = vpop.permute.xlu1 %631 }
  0xec   : > { %719 = vst.msk [vmem:[#allocation3 + $0x48] sm:$0xff] %vm709_vm3, %v632_v25  ;;  %v638_v62 = vpop.permute.xlu0 %637 }
  0xed   : > { %1005 = vrot.lane.b32.xlu1 %v2955_v31, %s2736_s25  ;;  %722 = vst.msk [vmem:[#allocation3 + $0x60] sm:$0xff] %vm709_vm3, %v638_v62 }
  0xee   : > { %1033 = vrot.lane.b32.xlu0 %v3100_v13, %s2736_s25 }
  0xef   : > { %v636_v0 = vpop.permute.xlu1 %635 }
  0xf0   : > { %721 = vst.msk [vmem:[#allocation3 + $0x58] sm:$0xff] %vm709_vm3, %v636_v0  ;;  %v642_v27 = vpop.permute.xlu0 %641 }
  0xf1   : > { %1031 = vrot.lane.b32.xlu1 %v3015_v56, %s2736_s25  ;;  %724 = vst.msk [vmem:[#allocation3 + $0x70] sm:$0xff] %vm709_vm3, %v642_v27 }
  0xf2   : > { %1224 = vrot.lane.b32.xlu0 %v3195_v28, %s2737_s26 }
  0xf3   : > { %v640_v30 = vpop.permute.xlu1 %639 }
  0xf4   : > { %723 = vst.msk [vmem:[#allocation3 + $0x68] sm:$0xff] %vm709_vm3, %v640_v30  ;;  %v646_v1 = vpop.permute.xlu0 %645 }
  0xf5   : > { %1192 = vrot.lane.b32.xlu1 %v3155_v39, %s2737_s26  ;;  %726 = vst.msk [vmem:[#allocation3 + $0x80] sm:$0xff] %vm709_vm3, %v646_v1 }
  0xf6   : > { %1226 = vrot.lane.b32.xlu0 %v3203_v34, %s2737_s26 }
  0xf7   : > { %v644_v13 = vpop.permute.xlu1 %643 }
  0xf8   : > { %725 = vst.msk [vmem:[#allocation3 + $0x78] sm:$0xff] %vm709_vm3, %v644_v13  ;;  %v650_v56 = vpop.permute.xlu0 %649 }
  0xf9   : > { %1194 = vrot.lane.b32.xlu1 %v3163_v42, %s2737_s26  ;;  %728 = vst.msk [vmem:[#allocation3 + $0x90] sm:$0xff] %vm709_vm3, %v650_v56  ;;  %v1519_v56 = vld [vmem:[#allocation2 + $0x61] sm:$0xff] }
  0xfa   : > { %1418 = vrot.lane.b32.xlu0 %v3063_v5, %s2738_s27 }
  0xfb   : > { %v648_v28 = vpop.permute.xlu1 %647 }
  0xfc   : > { %727 = vst.msk [vmem:[#allocation3 + $0x88] sm:$0xff] %vm709_vm3, %v648_v28  ;;  %v654_v39 = vpop.permute.xlu0 %653 }
  0xfd   : > { %1386 = vrot.lane.b32.xlu1 %v2998_v49, %s2738_s27  ;;  %730 = vst.msk [vmem:[#allocation3 + $0xa0] sm:$0xff] %vm709_vm3, %v654_v39 }
  0xfe   : > { %1420 = vrot.lane.b32.xlu0 %v3075_v8, %s2738_s27  ;;  %v1933_v8 = vld [vmem:[%s3976_s1] sm:$0xff] }
  0xff   : > { %v652_v34 = vpop.permute.xlu1 %651 }
 0x100   : > { %729 = vst.msk [vmem:[#allocation3 + $0x98] sm:$0xff] %vm709_vm3, %v652_v34  ;;  %v658_v42 = vpop.permute.xlu0 %657 }
 0x101   : > { %1388 = vrot.lane.b32.xlu1 %v3011_v54, %s2738_s27  ;;  %732 = vst.msk [vmem:[#allocation3 + $0xb0] sm:$0xff] %vm709_vm3, %v658_v42  ;;  %v1934_v54 = vld [vmem:[%s3976_s1 + $0x8] sm:$0xff] }
 0x102   : > { %1611 = vrot.lane.b32.xlu0 %v3089_v11, %s2739_s28  ;;  %v2693_v2 = vpack.c.bf16 %v1934_v54, %v1933_v8  ;;  %v1728_v54 = vld [vmem:[#allocation2 + $0x122] sm:$0xff] }
 0x103   : > { %v656_v5 = vpop.permute.xlu1 %655 }
 0x104   : > { %731 = vst.msk [vmem:[#allocation3 + $0xa8] sm:$0xff] %vm709_vm3, %v656_v5  ;;  %v662_v49 = vpop.permute.xlu0 %661  ;;  %2701 = vmatprep.subr.bf16.mxu1 %v2693_v2  ;;  %2694 = vmatprep.subr.bf16.mxu0 %v2693_v2  ;;  %v1536_v5 = vld [vmem:[#allocation2 + $0x129] sm:$0xff] }
 0x105   : > { %1579 = vrot.lane.b32.xlu1 %v2926_v26, %s2739_s28  ;;  %734 = vst.msk [vmem:[#allocation3 + $0xc0] sm:$0xff] %vm709_vm3, %v662_v49  ;;  %2704 = vmatpush3.bf16.msra.mxu1 %v2693_v2 }
 0x106   : > { %1581 = vrot.lane.b32.xlu0 %v2955_v31, %s2739_s28  ;;  %v2697_v31 = vpack.c.bf16 %v1936_v23, %v1935_v4  ;;  %2696 = vmatpush3.bf16.msra.mxu0 %v2693_v2 }
 0x107   : > { %v660_v3 = vpop.permute.xlu1 %659 }
 0x108   : > { %733 = vst.msk [vmem:[#allocation3 + $0xb8] sm:$0xff] %vm709_vm3, %v660_v3  ;;  %v666_v26 = vpop.permute.xlu0 %665  ;;  %2702 = vmatprep.subr.bf16.mxu1 %v2697_v31  ;;  %2698 = vmatprep.subr.bf16.mxu0 %v2697_v31 }
 0x109   : > { %1035 = vrot.lane.b32.xlu1 %v3089_v11, %s2736_s25  ;;  %736 = vst.msk [vmem:[#allocation3 + $0xd0] sm:$0xff] %vm709_vm3, %v666_v26  ;;  %2705 = vmatpush3.bf16.msra.mxu1 %v2697_v31 }
 0x10a   : > { %1772 = vrot.lane.b32.xlu0 %v3160_v41, %s2740_s10  ;;  %2700 = vmatpush3.bf16.msra.mxu0 %v2697_v31  ;;  %v1135_v31 = vld [vmem:[#allocation2 + $0x6a] sm:$0xff] }
 0x10b   : > { %v664_v6 = vpop.permute.xlu1 %663  ;;  %2703 = vmatprep.subr.msk.mxu1 %vm2042_vm4, %v1937_v24  ;;  %2643 = vmatprep.subr.msk.mxu0 %vm2042_vm4, %v1937_v24 }
 0x10c   : > { %735 = vst.msk [vmem:[#allocation3 + $0xc8] sm:$0xff] %vm709_vm3, %v664_v6  ;;  %v670_v11 = vpop.permute.xlu0 %669 }
 0x10d   : > { %1613 = vrot.lane.b32.xlu1 %v3116_v17, %s2739_s28  ;;  %738 = vst.msk [vmem:[#allocation3 + $0xe0] sm:$0xff] %vm709_vm3, %v670_v11  ;;  %2706 = vmatpush3.msk.msra.mxu1 %vm2042_vm4, %v1937_v24 }
 0x10e   : > { %1037 = vrot.lane.b32.xlu0 %v3116_v17, %s2736_s25  ;;  %2644 = vmatpush3.msk.msra.mxu0 %vm2042_vm4, %v1937_v24 }
 0x10f   : > { %v668_v48 = vpop.permute.xlu1 %667 }
 0x110   : > { %737 = vst.msk [vmem:[#allocation3 + $0xd8] sm:$0xff] %vm709_vm3, %v668_v48  ;;  %v674_v32 = vpop.permute.xlu0 %673 }
 0x111   : > { %1804 = vrot.lane.b32.xlu1 %v3200_v33, %s2740_s10  ;;  %740 = vst.msk [vmem:[#allocation3 + $0xf0] sm:$0xff] %vm709_vm3, %v674_v32 }
 0x112   : > { %1228 = vrot.lane.b32.xlu0 %v3200_v33, %s2737_s26 }
 0x113   : > { %v672_v17 = vpop.permute.xlu1 %671 }
 0x114   : > { %739 = vst.msk [vmem:[#allocation3 + $0xe8] sm:$0xff] %vm709_vm3, %v672_v17  ;;  %v807_v51 = vpop.permute.xlu0 %806  ;;  %v1521_v17 = vld [vmem:[#allocation2 + $0x79] sm:$0xff] }
 0x115   : > { %1196 = vrot.lane.b32.xlu1 %v3160_v41, %s2737_s26  ;;  %903 = vst.msk [vmem:[#allocation3] sm:$0xff] %vm902_vm5, %v807_v51 }
 0x116   : > { %1806 = vrot.lane.b32.xlu0 %v3211_v36, %s2740_s10 }
 0x117   : > { %v676_v37 = vpop.permute.xlu1 %675 }
 0x118   : > { %741 = vst.msk [vmem:[#allocation3 + $0xf8] sm:$0xff] %vm709_vm3, %v676_v37  ;;  %v811_v40 = vpop.permute.xlu0 %810 }
 0x119   : > { %1774 = vrot.lane.b32.xlu1 %v3171_v44, %s2740_s10  ;;  %905 = vst.msk [vmem:[#allocation3 + $0x10] sm:$0xff] %vm902_vm5, %v811_v40 }
 0x11a   : > { %1230 = vrot.lane.b32.xlu0 %v3211_v36, %s2737_s26 }
 0x11b   : > { %v809_v33 = vpop.permute.xlu1 %808 }
 0x11c   : > { %904 = vst.msk [vmem:[#allocation3 + $0x8] sm:$0xff] %vm902_vm5, %v809_v33  ;;  %v815_v41 = vpop.permute.xlu0 %814  ;;  %v1522_v33 = vld [vmem:[#allocation2 + $0x81] sm:$0xff] }
 0x11d   : > { %1198 = vrot.lane.b32.xlu1 %v3171_v44, %s2737_s26  ;;  %907 = vst.msk [vmem:[#allocation3 + $0x20] sm:$0xff] %vm902_vm5, %v815_v41 }
 0x11e   : > { %1422 = vrot.lane.b32.xlu0 %v3073_v7, %s2738_s27  ;;  %v1517_v7 = vld [vmem:[#allocation2 + $0x49] sm:$0xff] }
 0x11f   : > { %v813_v47 = vpop.permute.xlu1 %812 }
 0x120   : > { %906 = vst.msk [vmem:[#allocation3 + $0x18] sm:$0xff] %vm902_vm5, %v813_v47  ;;  %v819_v53 = vpop.permute.xlu0 %818  ;;  %v1714_v47 = vld [vmem:[#allocation2 + $0x7a] sm:$0xff] }
 0x121   : > { %1390 = vrot.lane.b32.xlu1 %v3004_v52, %s2738_s27  ;;  %909 = vst.msk [vmem:[#allocation3 + $0x30] sm:$0xff] %vm902_vm5, %v819_v53  ;;  %v1518_v52 = vld [vmem:[#allocation2 + $0x51] sm:$0xff]  ;;  %v1538_v53 = vld [vmem:[#allocation2 + $0x141] sm:$0xff] }
 0x122   : > { %1424 = vrot.lane.b32.xlu0 %v3087_v10, %s2738_s27  ;;  %v955_v10 = vld [vmem:[#allocation2 + $0x109] sm:$0xff] }
 0x123   : > { %v817_v36 = vpop.permute.xlu1 %816 }
 0x124   : > { %908 = vst.msk [vmem:[#allocation3 + $0x28] sm:$0xff] %vm902_vm5, %v817_v36  ;;  %v823_v44 = vpop.permute.xlu0 %822 }
 0x125   : > { %1392 = vrot.lane.b32.xlu1 %v3021_v57, %s2738_s27  ;;  %911 = vst.msk [vmem:[#allocation3 + $0x40] sm:$0xff] %vm902_vm5, %v823_v44 }
 0x126   : > { %1615 = vrot.lane.b32.xlu0 %v3106_v15, %s2739_s28  ;;  %v1534_v15 = vld [vmem:[#allocation2 + $0x111] sm:$0xff] }
 0x127   : > { %v821_v63 = vpop.permute.xlu1 %820 }
 0x128   : > { %910 = vst.msk [vmem:[#allocation3 + $0x38] sm:$0xff] %vm902_vm5, %v821_v63  ;;  %v827_v20 = vpop.permute.xlu0 %826 }
 0x129   : > { %1583 = vrot.lane.b32.xlu1 %v1517_v7, %s2739_s28  ;;  %913 = vst.msk [vmem:[#allocation3 + $0x50] sm:$0xff] %vm902_vm5, %v827_v20  ;;  %v1730_v7 = vld [vmem:[#allocation2 + $0x13a] sm:$0xff] }
 0x12a   : > { %1585 = vrot.lane.b32.xlu0 %v1518_v52, %s2739_s28 }
 0x12b   : > { %v825_v19 = vpop.permute.xlu1 %824 }
 0x12c   : > { %912 = vst.msk [vmem:[#allocation3 + $0x48] sm:$0xff] %vm902_vm5, %v825_v19  ;;  %v831_v57 = vpop.permute.xlu0 %830  ;;  %v1715_v19 = vld [vmem:[#allocation2 + $0x82] sm:$0xff] }
 0x12d   : > { %1039 = vrot.lane.b32.xlu1 %v955_v10, %s2736_s25  ;;  %915 = vst.msk [vmem:[#allocation3 + $0x60] sm:$0xff] %vm902_vm5, %v831_v57 }
 0x12e   : > { %1776 = vrot.lane.b32.xlu0 %v3167_v43, %s2740_s10 }
 0x12f   : > { %v829_v60 = vpop.permute.xlu1 %828 }
 0x130   : > { %914 = vst.msk [vmem:[#allocation3 + $0x58] sm:$0xff] %vm902_vm5, %v829_v60  ;;  %v835_v21 = vpop.permute.xlu0 %834 }
 0x131   : > { %1617 = vrot.lane.b32.xlu1 %v1534_v15, %s2739_s28  ;;  %917 = vst.msk [vmem:[#allocation3 + $0x70] sm:$0xff] %vm902_vm5, %v835_v21 }
 0x132   : > { %1009 = vrot.lane.b32.xlu0 %v1518_v52, %s2736_s25 }
 0x133   : > { %v833_v29 = vpop.permute.xlu1 %832 }
 0x134   : > { %916 = vst.msk [vmem:[#allocation3 + $0x68] sm:$0xff] %vm902_vm5, %v833_v29  ;;  %v839_v25 = vpop.permute.xlu0 %838  ;;  %v1731_v29 = vld [vmem:[#allocation2 + $0x142] sm:$0xff] }
 0x135   : > { %1808 = vrot.lane.b32.xlu1 %v3207_v35, %s2740_s10  ;;  %919 = vst.msk [vmem:[#allocation3 + $0x80] sm:$0xff] %vm902_vm5, %v839_v25 }
 0x136   : > { %1200 = vrot.lane.b32.xlu0 %v3167_v43, %s2737_s26 }
 0x137   : > { %v837_v62 = vpop.permute.xlu1 %836 }
 0x138   : > { %918 = vst.msk [vmem:[#allocation3 + $0x78] sm:$0xff] %vm902_vm5, %v837_v62  ;;  %v843_v0 = vpop.permute.xlu0 %842  ;;  %v1330_v62 = vld [vmem:[#allocation2 + $0x90] sm:$0xff] }
 0x139   : > { %1041 = vrot.lane.b32.xlu1 %v1534_v15, %s2736_s25  ;;  %921 = vst.msk [vmem:[#allocation3 + $0x90] sm:$0xff] %vm902_vm5, %v843_v0 }
 0x13a   : > { %1778 = vrot.lane.b32.xlu0 %v3179_v46, %s2740_s10 }
 0x13b   : > { %v841_v27 = vpop.permute.xlu1 %840 }
 0x13c   : > { %920 = vst.msk [vmem:[#allocation3 + $0x88] sm:$0xff] %vm902_vm5, %v841_v27  ;;  %v847_v30 = vpop.permute.xlu0 %846 }
 0x13d   : > { %1232 = vrot.lane.b32.xlu1 %v3207_v35, %s2737_s26  ;;  %923 = vst.msk [vmem:[#allocation3 + $0xa0] sm:$0xff] %vm902_vm5, %v847_v30 }
 0x13e   : > { %1202 = vrot.lane.b32.xlu0 %v3179_v46, %s2737_s26 }
 0x13f   : > { %v845_v43 = vpop.permute.xlu1 %844 }
 0x140   : > { %922 = vst.msk [vmem:[#allocation3 + $0x98] sm:$0xff] %vm902_vm5, %v845_v43  ;;  %v851_v1 = vpop.permute.xlu0 %850 }
 0x141   : > { %1810 = vrot.lane.b32.xlu1 %v3217_v38, %s2740_s10  ;;  %925 = vst.msk [vmem:[#allocation3 + $0xb0] sm:$0xff] %vm902_vm5, %v851_v1  ;;  %v1331_v1 = vld [vmem:[#allocation2 + $0x98] sm:$0xff] }
 0x142   : > { %1394 = vrot.lane.b32.xlu0 %v3013_v55, %s2738_s27 }
 0x143   : > { %v849_v13 = vpop.permute.xlu1 %848 }
 0x144   : > { %924 = vst.msk [vmem:[#allocation3 + $0xa8] sm:$0xff] %vm902_vm5, %v849_v13  ;;  %v855_v35 = vpop.permute.xlu0 %854 }
 0x145   : > { %1234 = vrot.lane.b32.xlu1 %v3217_v38, %s2737_s26  ;;  %927 = vst.msk [vmem:[#allocation3 + $0xc0] sm:$0xff] %vm902_vm5, %v855_v35 }
 0x146   : > { %1396 = vrot.lane.b32.xlu0 %v3025_v59, %s2738_s27  ;;  %v1535_v59 = vld [vmem:[#allocation2 + $0x121] sm:$0xff] }
 0x147   : > { %v853_v46 = vpop.permute.xlu1 %852 }
 0x148   : > { %926 = vst.msk [vmem:[#allocation3 + $0xb8] sm:$0xff] %vm902_vm5, %v853_v46  ;;  %v859_v28 = vpop.permute.xlu0 %858  ;;  %v1523_v46 = vld [vmem:[#allocation2 + $0x91] sm:$0xff] }
 0x149   : > { %1426 = vrot.lane.b32.xlu1 %v3085_v9, %s2738_s27  ;;  %929 = vst.msk [vmem:[#allocation3 + $0xd0] sm:$0xff] %vm902_vm5, %v859_v28  ;;  %v1520_v9 = vld [vmem:[#allocation2 + $0x69] sm:$0xff] }
 0x14a   : > { %1587 = vrot.lane.b32.xlu0 %v1519_v56, %s2739_s28 }
 0x14b   : > { %v857_v55 = vpop.permute.xlu1 %856 }
 0x14c   : > { %928 = vst.msk [vmem:[#allocation3 + $0xc8] sm:$0xff] %vm902_vm5, %v857_v55  ;;  %v863_v38 = vpop.permute.xlu0 %862 }
 0x14d   : > { %1428 = vrot.lane.b32.xlu1 %v3104_v14, %s2738_s27  ;;  %931 = vst.msk [vmem:[#allocation3 + $0xe0] sm:$0xff] %vm902_vm5, %v863_v38  ;;  %v1539_v38 = vld [vmem:[#allocation2 + $0x151] sm:$0xff] }
 0x14e   : > { %1011 = vrot.lane.b32.xlu0 %v1519_v56, %s2736_s25 }
 0x14f   : > { %v861_v39 = vpop.permute.xlu1 %860 }
 0x150   : > { %930 = vst.msk [vmem:[#allocation3 + $0xd8] sm:$0xff] %vm902_vm5, %v861_v39  ;;  %v867_v34 = vpop.permute.xlu0 %866  ;;  %v1524_v39 = vld [vmem:[#allocation2 + $0x99] sm:$0xff] }
 0x151   : > { %1619 = vrot.lane.b32.xlu1 %v1535_v59, %s2739_s28  ;;  %933 = vst.msk [vmem:[#allocation3 + $0xf0] sm:$0xff] %vm902_vm5, %v867_v34  ;;  %v1716_v34 = vld [vmem:[#allocation2 + $0x92] sm:$0xff] }
 0x152   : > { %1589 = vrot.lane.b32.xlu0 %v1520_v9, %s2739_s28 }
 0x153   : > { %v865_v42 = vpop.permute.xlu1 %864 }
 0x154   : > { %932 = vst.msk [vmem:[#allocation3 + $0xe8] sm:$0xff] %vm902_vm5, %v865_v42  ;;  %v1000_v14 = vpop.permute.xlu0 %999  ;;  %v1540_v42 = vld [vmem:[#allocation2 + $0x159] sm:$0xff] }
 0x155   : > { %1043 = vrot.lane.b32.xlu1 %v1535_v59, %s2736_s25  ;;  %1096 = vst.msk [vmem:[#allocation3] sm:$0xff] %vm1095_vm6, %v1000_v14 }
 0x156   : > { %1780 = vrot.lane.b32.xlu0 %v3175_v45, %s2740_s10 }
 0x157   : > { %v869_v49 = vpop.permute.xlu1 %868 }
 0x158   : > { %934 = vst.msk [vmem:[#allocation3 + $0xf8] sm:$0xff] %vm902_vm5, %v869_v49  ;;  %v1004_v8 = vpop.permute.xlu0 %1003 }
 0x159   : > { %1621 = vrot.lane.b32.xlu1 %v1536_v5, %s2739_s28  ;;  %1098 = vst.msk [vmem:[#allocation3 + $0x10] sm:$0xff] %vm1095_vm6, %v1004_v8  ;;  %v1732_v8 = vld [vmem:[#allocation2 + $0x152] sm:$0xff] }
 0x15a   : > { %1013 = vrot.lane.b32.xlu0 %v1520_v9, %s2736_s25 }
 0x15b   : > { %v1002_v2 = vpop.permute.xlu1 %1001 }
 0x15c   : > { %1097 = vst.msk [vmem:[#allocation3 + $0x8] sm:$0xff] %vm1095_vm6, %v1002_v2  ;;  %v1008_v3 = vpop.permute.xlu0 %1007 }
 0x15d   : > { %1812 = vrot.lane.b32.xlu1 %v1728_v54, %s2740_s10  ;;  %1100 = vst.msk [vmem:[#allocation3 + $0x20] sm:$0xff] %vm1095_vm6, %v1008_v3 }
 0x15e   : > { %1204 = vrot.lane.b32.xlu0 %v3175_v45, %s2737_s26  ;;  %v1729_v45 = vld [vmem:[#allocation2 + $0x12a] sm:$0xff] }
 0x15f   : > { %v1006_v26 = vpop.permute.xlu1 %1005 }
 0x160   : > { %1099 = vst.msk [vmem:[#allocation3 + $0x18] sm:$0xff] %vm1095_vm6, %v1006_v26  ;;  %v1034_v4 = vpop.permute.xlu0 %1033 }
 0x161   : > { %1045 = vrot.lane.b32.xlu1 %v1536_v5, %s2736_s25  ;;  %1113 = vst.msk [vmem:[#allocation3 + $0x88] sm:$0xff] %vm1095_vm6, %v1034_v4  ;;  %v1717_v4 = vld [vmem:[#allocation2 + $0x9a] sm:$0xff] }
 0x162   : > { %1782 = vrot.lane.b32.xlu0 %v3185_v50, %s2740_s10 }
 0x163   : > { %v1032_v23 = vpop.permute.xlu1 %1031 }
 0x164   : > { %1112 = vst.msk [vmem:[#allocation3 + $0x80] sm:$0xff] %vm1095_vm6, %v1032_v23  ;;  %v1225_v6 = vpop.permute.xlu0 %1224 }
 0x165   : > { %1236 = vrot.lane.b32.xlu1 %v1728_v54, %s2737_s26  ;;  %1305 = vst.msk [vmem:[#allocation3 + $0x80] sm:$0xff] %vm1288_vm7, %v1225_v6 }
 0x166   : > { %1206 = vrot.lane.b32.xlu0 %v1135_v31, %s2737_s26 }
 0x167   : > { %v1193_v11 = vpop.permute.xlu1 %1192 }
 0x168   : > { %1289 = vst.msk [vmem:[#allocation3] sm:$0xff] %vm1288_vm7, %v1193_v11  ;;  %v1227_v48 = vpop.permute.xlu0 %1226  ;;  %v1733_v11 = vld [vmem:[#allocation2 + $0x15a] sm:$0xff] }
 0x169   : > { %1814 = vrot.lane.b32.xlu1 %v1729_v45, %s2740_s10  ;;  %1306 = vst.msk [vmem:[#allocation3 + $0x88] sm:$0xff] %vm1288_vm7, %v1227_v48 }
 0x16a   : > { %1398 = vrot.lane.b32.xlu0 %v3023_v58, %s2738_s27 }
 0x16b   : > { %v1195_v50 = vpop.permute.xlu1 %1194 }
 0x16c   : > { %1290 = vst.msk [vmem:[#allocation3 + $0x8] sm:$0xff] %vm1288_vm7, %v1195_v50  ;;  %v1419_v24 = vpop.permute.xlu0 %1418  ;;  %v1332_v50 = vld [vmem:[#allocation2 + $0xa8] sm:$0xff] }
 0x16d   : > { %1238 = vrot.lane.b32.xlu1 %v1729_v45, %s2737_s26  ;;  %1499 = vst.msk [vmem:[#allocation3 + $0x80] sm:$0xff] %vm1482_vm8, %v1419_v24 }
 0x16e   : > { %1400 = vrot.lane.b32.xlu0 %v3036_v61, %s2738_s27  ;;  %v1537_v61 = vld [vmem:[#allocation2 + $0x139] sm:$0xff] }
 0x16f   : > { %v1387_v32 = vpop.permute.xlu1 %1386 }
 0x170   : > { %1483 = vst.msk [vmem:[#allocation3] sm:$0xff] %vm1482_vm8, %v1387_v32  ;;  %v1421_v51 = vpop.permute.xlu0 %1420 }
 0x171   : > { %1430 = vrot.lane.b32.xlu1 %v3095_v12, %s2738_s27  ;;  %1500 = vst.msk [vmem:[#allocation3 + $0x88] sm:$0xff] %vm1482_vm8, %v1421_v51  ;;  %v1333_v51 = vld [vmem:[#allocation2 + $0xb0] sm:$0xff] }
 0x172   : > { %1591 = vrot.lane.b32.xlu0 %v1521_v17, %s2739_s28 }
 0x173   : > { %v1389_v58 = vpop.permute.xlu1 %1388 }
 0x174   : > { %1484 = vst.msk [vmem:[#allocation3 + $0x8] sm:$0xff] %vm1482_vm8, %v1389_v58  ;;  %v1612_v37 = vpop.permute.xlu0 %1611 }
 0x175   : > { %1432 = vrot.lane.b32.xlu1 %v3120_v18, %s2738_s27  ;;  %1692 = vst.msk [vmem:[#allocation3 + $0x80] sm:$0xff] %vm1675_vm9, %v1612_v37  ;;  %v1348_v37 = vld [vmem:[#allocation2 + $0x168] sm:$0xff] }
 0x176   : > { %1015 = vrot.lane.b32.xlu0 %v1521_v17, %s2736_s25 }
 0x177   : > { %v1580_v40 = vpop.permute.xlu1 %1579 }
 0x178   : > { %1676 = vst.msk [vmem:[#allocation3] sm:$0xff] %vm1675_vm9, %v1580_v40  ;;  %v1582_v12 = vpop.permute.xlu0 %1581  ;;  %v1525_v40 = vld [vmem:[#allocation2 + $0xa9] sm:$0xff] }
 0x179   : > { %1623 = vrot.lane.b32.xlu1 %v1537_v61, %s2739_s28  ;;  %1677 = vst.msk [vmem:[#allocation3 + $0x8] sm:$0xff] %vm1675_vm9, %v1582_v12  ;;  %v1349_v12 = vld [vmem:[#allocation2 + $0x170] sm:$0xff] }
 0x17a   : > { %1593 = vrot.lane.b32.xlu0 %v1522_v33, %s2739_s28 }
 0x17b   : > { %v1036_v41 = vpop.permute.xlu1 %1035 }
 0x17c   : > { %1114 = vst.msk [vmem:[#allocation3 + $0x90] sm:$0xff] %vm1095_vm6, %v1036_v41  ;;  %v1773_v18 = vpop.permute.xlu0 %1772 }
 0x17d   : > { %1047 = vrot.lane.b32.xlu1 %v1537_v61, %s2736_s25  ;;  %1869 = vst.msk [vmem:[#allocation3] sm:$0xff] %vm1868_vm10, %v1773_v18  ;;  %v1541_v18 = vld [vmem:[#allocation2 + $0x169] sm:$0xff] }
 0x17e   : > { %1784 = vrot.lane.b32.xlu0 %v1714_v47, %s2740_s10 }
 0x17f   : > { %v1614_v36 = vpop.permute.xlu1 %1613 }
 0x180   : > { %1693 = vst.msk [vmem:[#allocation3 + $0x88] sm:$0xff] %vm1675_vm9, %v1614_v36  ;;  %v1038_v44 = vpop.permute.xlu0 %1037  ;;  %v1526_v36 = vld [vmem:[#allocation2 + $0xb1] sm:$0xff] }
 0x181   : > { %1625 = vrot.lane.b32.xlu1 %v1538_v53, %s2739_s28  ;;  %1115 = vst.msk [vmem:[#allocation3 + $0x98] sm:$0xff] %vm1095_vm6, %v1038_v44 }
 0x182   : > { %1017 = vrot.lane.b32.xlu0 %v1522_v33, %s2736_s25 }
 0x183   : > { %v1805_v63 = vpop.permute.xlu1 %1804 }
 0x184   : > { %1885 = vst.msk [vmem:[#allocation3 + $0x80] sm:$0xff] %vm1868_vm10, %v1805_v63  ;;  %v1229_v52 = vpop.permute.xlu0 %1228  ;;  %v1901_v20 = vld [vmem:[#allocation3] sm:$0xff] }
 0x185   : > { %1816 = vrot.lane.b32.xlu1 %v1730_v7, %s2740_s10  ;;  %1307 = vst.msk [vmem:[#allocation3 + $0x90] sm:$0xff] %vm1288_vm7, %v1229_v52  ;;  %2645 = vmatprep.mubr.msk.f32.mxu0 %vm1945_vm11, %v1901_v20  ;;  %v1718_v63 = vld [vmem:[#allocation2 + $0xaa] sm:$0xff] }
 0x186   : > { %1208 = vrot.lane.b32.xlu0 %v1714_v47, %s2737_s26  ;;  %v1542_v20 = vld [vmem:[#allocation2 + $0x171] sm:$0xff] }
 0x187   : > { %v1197_v10 = vpop.permute.xlu1 %1196 }
 0x188   : > { %1291 = vst.msk [vmem:[#allocation3 + $0x10] sm:$0xff] %vm1288_vm7, %v1197_v10  ;;  %v1807_v57 = vpop.permute.xlu0 %1806 }
 0x189   : > { %1049 = vrot.lane.b32.xlu1 %v1538_v53, %s2736_s25  ;;  %1886 = vst.msk [vmem:[#allocation3 + $0x88] sm:$0xff] %vm1868_vm10, %v1807_v57 }
 0x18a   : > { %1786 = vrot.lane.b32.xlu0 %v1715_v19, %s2740_s10 }
 0x18b   : > { %v1775_v15 = vpop.permute.xlu1 %1774  ;;  %v1917_v60 = vld [vmem:[#allocation3 + $0x80] sm:$0xff] }
 0x18c   : > { %1870 = vst.msk [vmem:[#allocation3 + $0x8] sm:$0xff] %vm1868_vm10, %v1775_v15  ;;  %2669 = vmatprep.mubr.msk.f32.mxu1 %vm1945_vm11, %v1917_v60  ;;  %v1231_v21 = vpop.permute.xlu0 %1230  ;;  %v1734_v15 = vld [vmem:[#allocation2 + $0x16a] sm:$0xff] }
 0x18d   : > { %1240 = vrot.lane.b32.xlu1 %v1730_v7, %s2737_s26  ;;  %1308 = vst.msk [vmem:[#allocation3 + $0x98] sm:$0xff] %vm1288_vm7, %v1231_v21 }
 0x18e   : > { %1210 = vrot.lane.b32.xlu0 %v1715_v19, %s2737_s26 }
 0x18f   : > { %v1199_v25 = vpop.permute.xlu1 %1198 }
 0x190   : > { %1292 = vst.msk [vmem:[#allocation3 + $0x18] sm:$0xff] %vm1288_vm7, %v1199_v25  ;;  %v1423_v0 = vpop.permute.xlu0 %1422  ;;  %v1918_v27 = vld [vmem:[#allocation3 + $0x88] sm:$0xff] }
 0x191   : > { %1818 = vrot.lane.b32.xlu1 %v1731_v29, %s2740_s10  ;;  %1501 = vst.msk [vmem:[#allocation3 + $0x90] sm:$0xff] %vm1482_vm8, %v1423_v0  ;;  %2670 = vmatmul.mubr.msk.f32.vlgmr.msra.gmra.mrb[0].mxu1 %vm1945_vm11, %v1918_v27 }
 0x192   : > { %1402 = vrot.lane.b32.xlu0 %v1330_v62, %s2738_s27  ;;  %v1719_v62 = vld [vmem:[#allocation2 + $0xb2] sm:$0xff] }
 0x193   : > { %v1391_v30 = vpop.permute.xlu1 %1390  ;;  %v1902_v43 = vld [vmem:[#allocation3 + $0x8] sm:$0xff] }
 0x194   : > { %1485 = vst.msk [vmem:[#allocation3 + $0x10] sm:$0xff] %vm1482_vm8, %v1391_v30  ;;  %2646 = vmatmul.mubr.msk.f32.vlgmr.msra.gmra.mrb[0].mxu0 %vm1945_vm11, %v1902_v43  ;;  %v1425_v13 = vpop.permute.xlu0 %1424 }
 0x195   : > { %1242 = vrot.lane.b32.xlu1 %v1731_v29, %s2737_s26  ;;  %1502 = vst.msk [vmem:[#allocation3 + $0x98] sm:$0xff] %vm1482_vm8, %v1425_v13 }
 0x196   : > { %1404 = vrot.lane.b32.xlu0 %v1331_v1, %s2738_s27  ;;  %v1735_v1 = vld [vmem:[#allocation2 + $0x172] sm:$0xff] }
 0x197   : > { %v1393_v35 = vpop.permute.xlu1 %1392 }
 0x198   : > { %1486 = vst.msk [vmem:[#allocation3 + $0x18] sm:$0xff] %vm1482_vm8, %v1393_v35  ;;  %v1616_v56 = vpop.permute.xlu0 %1615  ;;  %v1334_v35 = vld [vmem:[#allocation2 + $0xc0] sm:$0xff] }
 0x199   : > { %1434 = vrot.lane.b32.xlu1 %v3110_v16, %s2738_s27  ;;  %1694 = vst.msk [vmem:[#allocation3 + $0x90] sm:$0xff] %vm1675_vm9, %v1616_v56 }
 0x19a   : > { %1595 = vrot.lane.b32.xlu0 %v1523_v46, %s2739_s28 }
 0x19b   : > { %v1584_v28 = vpop.permute.xlu1 %1583 }
 0x19c   : > { %1678 = vst.msk [vmem:[#allocation3 + $0x10] sm:$0xff] %vm1675_vm9, %v1584_v28  ;;  %v1586_v55 = vpop.permute.xlu0 %1585 }
 0x19d   : > { %1436 = vrot.lane.b32.xlu1 %v3131_v22, %s2738_s27  ;;  %1679 = vst.msk [vmem:[#allocation3 + $0x18] sm:$0xff] %vm1675_vm9, %v1586_v55  ;;  %v1335_v55 = vld [vmem:[#allocation2 + $0xc8] sm:$0xff] }
 0x19e   : > { %1019 = vrot.lane.b32.xlu0 %v1523_v46, %s2736_s25 }
 0x19f   : > { %v1040_v59 = vpop.permute.xlu1 %1039 }
 0x1a0   : > { %1116 = vst.msk [vmem:[#allocation3 + $0xa0] sm:$0xff] %vm1095_vm6, %v1040_v59  ;;  %v1777_v16 = vpop.permute.xlu0 %1776  ;;  %v1350_v59 = vld [vmem:[#allocation2 + $0x180] sm:$0xff] }
 0x1a1   : > { %1627 = vrot.lane.b32.xlu1 %v1539_v38, %s2739_s28  ;;  %1871 = vst.msk [vmem:[#allocation3 + $0x10] sm:$0xff] %vm1868_vm10, %v1777_v16  ;;  %v1527_v16 = vld [vmem:[#allocation2 + $0xc1] sm:$0xff] }
 0x1a2   : > { %1597 = vrot.lane.b32.xlu0 %v1524_v39, %s2739_s28 }
 0x1a3   : > { %v1618_v9 = vpop.permute.xlu1 %1617 }
 0x1a4   : > { %1695 = vst.msk [vmem:[#allocation3 + $0x98] sm:$0xff] %vm1675_vm9, %v1618_v9  ;;  %v1010_v22 = vpop.permute.xlu0 %1009 }
 0x1a5   : > { %1051 = vrot.lane.b32.xlu1 %v1539_v38, %s2736_s25  ;;  %1101 = vst.msk [vmem:[#allocation3 + $0x28] sm:$0xff] %vm1095_vm6, %v1010_v22 }
 0x1a6   : > { %1788 = vrot.lane.b32.xlu0 %v1716_v34, %s2740_s10 }
 0x1a7   : > { %v1809_v14 = vpop.permute.xlu1 %1808 }
 0x1a8   : > { %1887 = vst.msk [vmem:[#allocation3 + $0x90] sm:$0xff] %vm1868_vm10, %v1809_v14  ;;  %v1201_v5 = vpop.permute.xlu0 %1200  ;;  %v1903_v49 = vld [vmem:[#allocation3 + $0x10] sm:$0xff] }
 0x1a9   : > { %1629 = vrot.lane.b32.xlu1 %v1540_v42, %s2739_s28  ;;  %1293 = vst.msk [vmem:[#allocation3 + $0x20] sm:$0xff] %vm1288_vm7, %v1201_v5  ;;  %2648 = vmatprep.mubr.msk.f32.mxu0 %vm1945_vm11, %v1903_v49  ;;  %v1543_v14 = vld [vmem:[#allocation2 + $0x181] sm:$0xff]  ;;  %v1528_v49 = vld [vmem:[#allocation2 + $0xc9] sm:$0xff] }
 0x1aa   : > { %1021 = vrot.lane.b32.xlu0 %v1524_v39, %s2736_s25 }
 0x1ab   : > { %v1042_v54 = vpop.permute.xlu1 %1041 }
 0x1ac   : > { %1117 = vst.msk [vmem:[#allocation3 + $0xa8] sm:$0xff] %vm1095_vm6, %v1042_v54  ;;  %v1779_v2 = vpop.permute.xlu0 %1778 }
 0x1ad   : > { %1820 = vrot.lane.b32.xlu1 %v1732_v8, %s2740_s10  ;;  %1872 = vst.msk [vmem:[#allocation3 + $0x18] sm:$0xff] %vm1868_vm10, %v1779_v2  ;;  %v1720_v2 = vld [vmem:[#allocation2 + $0xc2] sm:$0xff] }
 0x1ae   : > { %1212 = vrot.lane.b32.xlu0 %v1716_v34, %s2737_s26  ;;  %v1351_v34 = vld [vmem:[#allocation2 + $0x188] sm:$0xff] }
 0x1af   : > { %v1233_v3 = vpop.permute.xlu1 %1232  ;;  %v1919_v26 = vld [vmem:[#allocation3 + $0x90] sm:$0xff] }
 0x1b0   : > { %1309 = vst.msk [vmem:[#allocation3 + $0xa0] sm:$0xff] %vm1288_vm7, %v1233_v3  ;;  %2672 = vmatprep.mubr.msk.f32.mxu1 %vm1945_vm11, %v1919_v26  ;;  %v1203_v23 = vpop.permute.xlu0 %1202  ;;  %v1544_v26 = vld [vmem:[#allocation2 + $0x189] sm:$0xff] }
 0x1b1   : > { %1053 = vrot.lane.b32.xlu1 %v1540_v42, %s2736_s25  ;;  %1294 = vst.msk [vmem:[#allocation3 + $0x28] sm:$0xff] %vm1288_vm7, %v1203_v23 }
 0x1b2   : > { %1790 = vrot.lane.b32.xlu0 %v1717_v4, %s2740_s10 }
 0x1b3   : > { %v1811_v31 = vpop.permute.xlu1 %1810 }
 0x1b4   : > { %1888 = vst.msk [vmem:[#allocation3 + $0x98] sm:$0xff] %vm1868_vm10, %v1811_v31  ;;  %v1395_v6 = vpop.permute.xlu0 %1394  ;;  %v1904_v45 = vld [vmem:[#allocation3 + $0x18] sm:$0xff] }
 0x1b5   : > { %1244 = vrot.lane.b32.xlu1 %v1732_v8, %s2737_s26  ;;  %1487 = vst.msk [vmem:[#allocation3 + $0x20] sm:$0xff] %vm1482_vm8, %v1395_v6  ;;  %2649 = vmatmul.mubr.msk.f32.gmra.mrb[2].mxu0 %vm1945_vm11, %v1904_v45  ;;  %v1736_v6 = vld [vmem:[#allocation2 + $0x182] sm:$0xff] }
 0x1b6   : > { %1214 = vrot.lane.b32.xlu0 %v1717_v4, %s2737_s26 }
 0x1b7   : > { %v1235_v48 = vpop.permute.xlu1 %1234 }
 0x1b8   : > { %1310 = vst.msk [vmem:[#allocation3 + $0xa8] sm:$0xff] %vm1288_vm7, %v1235_v48  ;;  %v1397_v24 = vpop.permute.xlu0 %1396 }
 0x1b9   : > { %1822 = vrot.lane.b32.xlu1 %v1733_v11, %s2740_s10  ;;  %1488 = vst.msk [vmem:[#allocation3 + $0x28] sm:$0xff] %vm1482_vm8, %v1397_v24  ;;  %v1721_v24 = vld [vmem:[#allocation2 + $0xca] sm:$0xff] }
 0x1ba   : > { %1406 = vrot.lane.b32.xlu0 %v1332_v50, %s2738_s27 }
 0x1bb   : > { %v1427_v32 = vpop.permute.xlu1 %1426  ;;  %v1920_v17 = vld [vmem:[#allocation3 + $0x98] sm:$0xff] }
 0x1bc   : > { %1503 = vst.msk [vmem:[#allocation3 + $0xa0] sm:$0xff] %vm1482_vm8, %v1427_v32  ;;  %2673 = vmatmul.mubr.msk.f32.gmra.mrb[2].mxu1 %vm1945_vm11, %v1920_v17  ;;  %v1588_v58 = vpop.permute.xlu0 %1587 }
 0x1bd   : > { %1246 = vrot.lane.b32.xlu1 %v1733_v11, %s2737_s26  ;;  %1680 = vst.msk [vmem:[#allocation3 + $0x20] sm:$0xff] %vm1675_vm9, %v1588_v58 }
 0x1be   : > { %1408 = vrot.lane.b32.xlu0 %v1333_v51, %s2738_s27 }
 0x1bf   : > { %v1429_v61 = vpop.permute.xlu1 %1428 }
 0x1c0   : > { %1504 = vst.msk [vmem:[#allocation3 + $0xa8] sm:$0xff] %vm1482_vm8, %v1429_v61  ;;  %v1012_v33 = vpop.permute.xlu0 %1011 }
 0x1c1   : > { %1438 = vrot.lane.b32.xlu1 %v1348_v37, %s2738_s27  ;;  %1102 = vst.msk [vmem:[#allocation3 + $0x30] sm:$0xff] %vm1095_vm6, %v1012_v33  ;;  %v1737_v37 = vld [vmem:[#allocation2 + $0x18a] sm:$0xff] }
 0x1c2   : > { %1599 = vrot.lane.b32.xlu0 %v1525_v40, %s2739_s28 }
 0x1c3   : > { %v1620_v41 = vpop.permute.xlu1 %1619 }
 0x1c4   : > { %1696 = vst.msk [vmem:[#allocation3 + $0xa0] sm:$0xff] %vm1675_vm9, %v1620_v41  ;;  %v1590_v47 = vpop.permute.xlu0 %1589 }
 0x1c5   : > { %1440 = vrot.lane.b32.xlu1 %v1349_v12, %s2738_s27  ;;  %1681 = vst.msk [vmem:[#allocation3 + $0x28] sm:$0xff] %vm1675_vm9, %v1590_v47  ;;  %v1337_v47 = vld [vmem:[#allocation2 + $0xe0] sm:$0xff] }
 0x1c6   : > { %1023 = vrot.lane.b32.xlu0 %v1525_v40, %s2736_s25  ;;  %v1336_v40 = vld [vmem:[#allocation2 + $0xd8] sm:$0xff] }
 0x1c7   : > { %v1044_v53 = vpop.permute.xlu1 %1043 }
 0x1c8   : > { %1118 = vst.msk [vmem:[#allocation3 + $0xb0] sm:$0xff] %vm1095_vm6, %v1044_v53  ;;  %v1781_v44 = vpop.permute.xlu0 %1780  ;;  %v1352_v53 = vld [vmem:[#allocation2 + $0x198] sm:$0xff] }
 0x1c9   : > { %1631 = vrot.lane.b32.xlu1 %v1541_v18, %s2739_s28  ;;  %1873 = vst.msk [vmem:[#allocation3 + $0x20] sm:$0xff] %vm1868_vm10, %v1781_v44  ;;  %v1529_v44 = vld [vmem:[#allocation2 + $0xd9] sm:$0xff] }
 0x1ca   : > { %1601 = vrot.lane.b32.xlu0 %v1526_v36, %s2739_s28 }
 0x1cb   : > { %v1622_v7 = vpop.permute.xlu1 %1621 }
 0x1cc   : > { %1697 = vst.msk [vmem:[#allocation3 + $0xa8] sm:$0xff] %vm1675_vm9, %v1622_v7  ;;  %v1014_v52 = vpop.permute.xlu0 %1013 }
 0x1cd   : > { %1055 = vrot.lane.b32.xlu1 %v1541_v18, %s2736_s25  ;;  %1103 = vst.msk [vmem:[#allocation3 + $0x38] sm:$0xff] %vm1095_vm6, %v1014_v52 }
 0x1ce   : > { %1792 = vrot.lane.b32.xlu0 %v1718_v63, %s2740_s10 }
 0x1cf   : > { %v1813_v10 = vpop.permute.xlu1 %1812 }
 0x1d0   : > { %1889 = vst.msk [vmem:[#allocation3 + $0xa0] sm:$0xff] %vm1868_vm10, %v1813_v10  ;;  %v1205_v19 = vpop.permute.xlu0 %1204  ;;  %v1905_v57 = vld [vmem:[#allocation3 + $0x20] sm:$0xff] }
 0x1d1   : > { %1633 = vrot.lane.b32.xlu1 %v1542_v20, %s2739_s28  ;;  %1295 = vst.msk [vmem:[#allocation3 + $0x30] sm:$0xff] %vm1288_vm7, %v1205_v19  ;;  %2651 = vmatprep.mubr.msk.f32.mxu0 %vm1945_vm11, %v1905_v57  ;;  %v1545_v19 = vld [vmem:[#allocation2 + $0x199] sm:$0xff] }
 0x1d2   : > { %1025 = vrot.lane.b32.xlu0 %v1526_v36, %s2736_s25 }
 0x1d3   : > { %v1046_v60 = vpop.permute.xlu1 %1045 }
 0x1d4   : > { %1119 = vst.msk [vmem:[#allocation3 + $0xb8] sm:$0xff] %vm1095_vm6, %v1046_v60  ;;  %v1783_v21 = vpop.permute.xlu0 %1782 }
 0x1d5   : > { %1824 = vrot.lane.b32.xlu1 %v1734_v15, %s2740_s10  ;;  %1874 = vst.msk [vmem:[#allocation3 + $0x28] sm:$0xff] %vm1868_vm10, %v1783_v21  ;;  %v1546_v21 = vld [vmem:[#allocation2 + $0x1a1] sm:$0xff] }
 0x1d6   : > { %1216 = vrot.lane.b32.xlu0 %v1718_v63, %s2737_s26  ;;  %v1353_v63 = vld [vmem:[#allocation2 + $0x1a0] sm:$0xff] }
 0x1d7   : > { %v1237_v29 = vpop.permute.xlu1 %1236  ;;  %v1921_v25 = vld [vmem:[#allocation3 + $0xa0] sm:$0xff] }
 0x1d8   : > { %1311 = vst.msk [vmem:[#allocation3 + $0xb0] sm:$0xff] %vm1288_vm7, %v1237_v29  ;;  %2675 = vmatprep.mubr.msk.f32.mxu1 %vm1945_vm11, %v1921_v25  ;;  %v1207_v0 = vpop.permute.xlu0 %1206  ;;  %v1723_v25 = vld [vmem:[#allocation2 + $0xe2] sm:$0xff] }
 0x1d9   : > { %1057 = vrot.lane.b32.xlu1 %v1542_v20, %s2736_s25  ;;  %1296 = vst.msk [vmem:[#allocation3 + $0x38] sm:$0xff] %vm1288_vm7, %v1207_v0  ;;  %v1530_v20 = vld [vmem:[#allocation2 + $0xe1] sm:$0xff] }
 0x1da   : > { %1794 = vrot.lane.b32.xlu0 %v1719_v62, %s2740_s10  ;;  %v1738_v0 = vld [vmem:[#allocation2 + $0x19a] sm:$0xff] }
 0x1db   : > { %v1815_v27 = vpop.permute.xlu1 %1814 }
 0x1dc   : > { %1890 = vst.msk [vmem:[#allocation3 + $0xa8] sm:$0xff] %vm1868_vm10, %v1815_v27  ;;  %v1399_v30 = vpop.permute.xlu0 %1398  ;;  %v1906_v43 = vld [vmem:[#allocation3 + $0x28] sm:$0xff] }
 0x1dd   : > { %1248 = vrot.lane.b32.xlu1 %v1734_v15, %s2737_s26  ;;  %1489 = vst.msk [vmem:[#allocation3 + $0x30] sm:$0xff] %vm1482_vm8, %v1399_v30  ;;  %2652 = vmatmul.mubr.msk.f32.gmra.mrb[4].mxu0 %vm1945_vm11, %v1906_v43  ;;  %v1722_v15 = vld [vmem:[#allocation2 + $0xda] sm:$0xff] }
 0x1de   : > { %1218 = vrot.lane.b32.xlu0 %v1719_v62, %s2737_s26 }
 0x1df   : > { %v1239_v13 = vpop.permute.xlu1 %1238 }
 0x1e0   : > { %1312 = vst.msk [vmem:[#allocation3 + $0xb8] sm:$0xff] %vm1288_vm7, %v1239_v13  ;;  %v1401_v46 = vpop.permute.xlu0 %1400 }
 0x1e1   : > { %1826 = vrot.lane.b32.xlu1 %v1735_v1, %s2740_s10  ;;  %1490 = vst.msk [vmem:[#allocation3 + $0x38] sm:$0xff] %vm1482_vm8, %v1401_v46 }
 0x1e2   : > { %1410 = vrot.lane.b32.xlu0 %v1334_v35, %s2738_s27 }
 0x1e3   : > { %v1431_v56 = vpop.permute.xlu1 %1430  ;;  %v1922_v28 = vld [vmem:[#allocation3 + $0xa8] sm:$0xff] }
 0x1e4   : > { %1505 = vst.msk [vmem:[#allocation3 + $0xb0] sm:$0xff] %vm1482_vm8, %v1431_v56  ;;  %2676 = vmatmul.mubr.msk.f32.gmra.mrb[4].mxu1 %vm1945_vm11, %v1922_v28  ;;  %v1592_v38 = vpop.permute.xlu0 %1591 }
 0x1e5   : > { %1250 = vrot.lane.b32.xlu1 %v1735_v1, %s2737_s26  ;;  %1682 = vst.msk [vmem:[#allocation3 + $0x30] sm:$0xff] %vm1675_vm9, %v1592_v38  ;;  %v1739_v1 = vld [vmem:[#allocation2 + $0x1a2] sm:$0xff] }
 0x1e6   : > { %1412 = vrot.lane.b32.xlu0 %v1335_v55, %s2738_s27 }
 0x1e7   : > { %v1433_v39 = vpop.permute.xlu1 %1432 }
 0x1e8   : > { %1506 = vst.msk [vmem:[#allocation3 + $0xb8] sm:$0xff] %vm1482_vm8, %v1433_v39  ;;  %v1016_v9 = vpop.permute.xlu0 %1015 }
 0x1e9   : > { %1442 = vrot.lane.b32.xlu1 %v1350_v59, %s2738_s27  ;;  %1104 = vst.msk [vmem:[#allocation3 + $0x40] sm:$0xff] %vm1095_vm6, %v1016_v9 }
 0x1ea   : > { %1603 = vrot.lane.b32.xlu0 %v1527_v16, %s2739_s28 }
 0x1eb   : > { %v1624_v22 = vpop.permute.xlu1 %1623 }
 0x1ec   : > { %1698 = vst.msk [vmem:[#allocation3 + $0xb0] sm:$0xff] %vm1675_vm9, %v1624_v22  ;;  %v1594_v42 = vpop.permute.xlu0 %1593 }
 0x1ed   : > { %1444 = vrot.lane.b32.xlu1 %v1351_v34, %s2738_s27  ;;  %1683 = vst.msk [vmem:[#allocation3 + $0x38] sm:$0xff] %vm1675_vm9, %v1594_v42 }
 0x1ee   : > { %1027 = vrot.lane.b32.xlu0 %v1527_v16, %s2736_s25 }
 0x1ef   : > { %v1048_v5 = vpop.permute.xlu1 %1047 }
 0x1f0   : > { %1120 = vst.msk [vmem:[#allocation3 + $0xc0] sm:$0xff] %vm1095_vm6, %v1048_v5  ;;  %v1785_v8 = vpop.permute.xlu0 %1784 }
 0x1f1   : > { %1635 = vrot.lane.b32.xlu1 %v1543_v14, %s2739_s28  ;;  %1875 = vst.msk [vmem:[#allocation3 + $0x30] sm:$0xff] %vm1868_vm10, %v1785_v8 }
 0x1f2   : > { %1605 = vrot.lane.b32.xlu0 %v1528_v49, %s2739_s28 }
 0x1f3   : > { %v1626_v54 = vpop.permute.xlu1 %1625 }
 0x1f4   : > { %1699 = vst.msk [vmem:[#allocation3 + $0xb8] sm:$0xff] %vm1675_vm9, %v1626_v54  ;;  %v1018_v3 = vpop.permute.xlu0 %1017 }
 0x1f5   : > { %1059 = vrot.lane.b32.xlu1 %v1543_v14, %s2736_s25  ;;  %1105 = vst.msk [vmem:[#allocation3 + $0x48] sm:$0xff] %vm1095_vm6, %v1018_v3 }
 0x1f6   : > { %1796 = vrot.lane.b32.xlu0 %v1720_v2, %s2740_s10 }
 0x1f7   : > { %v1817_v4 = vpop.permute.xlu1 %1816 }
 0x1f8   : > { %1891 = vst.msk [vmem:[#allocation3 + $0xb0] sm:$0xff] %vm1868_vm10, %v1817_v4  ;;  %v1209_v23 = vpop.permute.xlu0 %1208  ;;  %v1907_v31 = vld [vmem:[#allocation3 + $0x30] sm:$0xff] }
 0x1f9   : > { %1637 = vrot.lane.b32.xlu1 %v1544_v26, %s2739_s28  ;;  %1297 = vst.msk [vmem:[#allocation3 + $0x40] sm:$0xff] %vm1288_vm7, %v1209_v23  ;;  %2654 = vmatprep.mubr.msk.f32.mxu0 %vm1945_vm11, %v1907_v31 }
 0x1fa   : > { %1029 = vrot.lane.b32.xlu0 %v1528_v49, %s2736_s25 }
 0x1fb   : > { %v1050_v45 = vpop.permute.xlu1 %1049 }
 0x1fc   : > { %1121 = vst.msk [vmem:[#allocation3 + $0xc8] sm:$0xff] %vm1095_vm6, %v1050_v45  ;;  %v1787_v11 = vpop.permute.xlu0 %1786 }
 0x1fd   : > { %1828 = vrot.lane.b32.xlu1 %v1736_v6, %s2740_s10  ;;  %1876 = vst.msk [vmem:[#allocation3 + $0x38] sm:$0xff] %vm1868_vm10, %v1787_v11 }
 0x1fe   : > { %1220 = vrot.lane.b32.xlu0 %v1720_v2, %s2737_s26 }
 0x1ff   : > { %v1241_v48 = vpop.permute.xlu1 %1240  ;;  %v1923_v50 = vld [vmem:[#allocation3 + $0xb0] sm:$0xff] }
 0x200   : > { %1313 = vst.msk [vmem:[#allocation3 + $0xc0] sm:$0xff] %vm1288_vm7, %v1241_v48  ;;  %2678 = vmatprep.mubr.msk.f32.mxu1 %vm1945_vm11, %v1923_v50  ;;  %v1211_v32 = vpop.permute.xlu0 %1210 }
 0x201   : > { %1061 = vrot.lane.b32.xlu1 %v1544_v26, %s2736_s25  ;;  %1298 = vst.msk [vmem:[#allocation3 + $0x48] sm:$0xff] %vm1288_vm7, %v1211_v32 }
 0x202   : > { %1798 = vrot.lane.b32.xlu0 %v1721_v24, %s2740_s10 }
 0x203   : > { %v1819_v17 = vpop.permute.xlu1 %1818 }
 0x204   : > { %1892 = vst.msk [vmem:[#allocation3 + $0xb8] sm:$0xff] %vm1868_vm10, %v1819_v17  ;;  %v1403_v51 = vpop.permute.xlu0 %1402  ;;  %v1908_v58 = vld [vmem:[#allocation3 + $0x38] sm:$0xff] }
 0x205   : > { %1252 = vrot.lane.b32.xlu1 %v1736_v6, %s2737_s26  ;;  %1491 = vst.msk [vmem:[#allocation3 + $0x40] sm:$0xff] %vm1482_vm8, %v1403_v51  ;;  %2655 = vmatmul.mubr.msk.f32.gmra.mrb[6].mxu0 %vm1945_vm11, %v1908_v58 }
 0x206   : > { %1222 = vrot.lane.b32.xlu0 %v1721_v24, %s2737_s26 }
 0x207   : > { %v1243_v61 = vpop.permute.xlu1 %1242 }
 0x208   : > { %1314 = vst.msk [vmem:[#allocation3 + $0xc8] sm:$0xff] %vm1288_vm7, %v1243_v61  ;;  %v1405_v33 = vpop.permute.xlu0 %1404 }
 0x209   : > { %1830 = vrot.lane.b32.xlu1 %v1737_v37, %s2740_s10  ;;  %1492 = vst.msk [vmem:[#allocation3 + $0x48] sm:$0xff] %vm1482_vm8, %v1405_v33 }
 0x20a   : > { %1414 = vrot.lane.b32.xlu0 %v1336_v40, %s2738_s27 }
 0x20b   : > { %v1435_v12 = vpop.permute.xlu1 %1434  ;;  %v1924_v41 = vld [vmem:[#allocation3 + $0xb8] sm:$0xff] }
 0x20c   : > { %1507 = vst.msk [vmem:[#allocation3 + $0xc0] sm:$0xff] %vm1482_vm8, %v1435_v12  ;;  %2679 = vmatmul.mubr.msk.f32.gmra.mrb[6].mxu1 %vm1945_vm11, %v1924_v41  ;;  %v1596_v18 = vpop.permute.xlu0 %1595 }
 0x20d   : > { %1254 = vrot.lane.b32.xlu1 %v1737_v37, %s2737_s26  ;;  %1684 = vst.msk [vmem:[#allocation3 + $0x40] sm:$0xff] %vm1675_vm9, %v1596_v18 }
 0x20e   : > { %1416 = vrot.lane.b32.xlu0 %v1337_v47, %s2738_s27 }
 0x20f   : > { %v1437_v36 = vpop.permute.xlu1 %1436 }
 0x210   : > { %1508 = vst.msk [vmem:[#allocation3 + $0xc8] sm:$0xff] %vm1482_vm8, %v1437_v36  ;;  %v1020_v7 = vpop.permute.xlu0 %1019 }
 0x211   : > { %1446 = vrot.lane.b32.xlu1 %v1352_v53, %s2738_s27  ;;  %1106 = vst.msk [vmem:[#allocation3 + $0x50] sm:$0xff] %vm1095_vm6, %v1020_v7  ;;  %v3784_v53 = vld [vmem:[%s3977_s2] ss:$0 sm:$0xff] }
 0x212   : > { %1607 = vrot.lane.b32.xlu0 %v1529_v44, %s2739_s28 }
 0x213   : > { %v1628_v52 = vpop.permute.xlu1 %1627 }
 0x214   : > { %1700 = vst.msk [vmem:[#allocation3 + $0xc0] sm:$0xff] %vm1675_vm9, %v1628_v52  ;;  %v1598_v10 = vpop.permute.xlu0 %1597 }
 0x215   : > { %1448 = vrot.lane.b32.xlu1 %v1353_v63, %s2738_s27  ;;  %1685 = vst.msk [vmem:[#allocation3 + $0x48] sm:$0xff] %vm1675_vm9, %v1598_v10 }
 0x216   : > { %1609 = vrot.lane.b32.xlu0 %v1530_v20, %s2739_s28 }
 0x217   : > { %v1052_v57 = vpop.permute.xlu1 %1051 }
 0x218   : > { %1122 = vst.msk [vmem:[#allocation3 + $0xd0] sm:$0xff] %vm1095_vm6, %v1052_v57  ;;  %v1789_v60 = vpop.permute.xlu0 %1788 }
 0x219   : > { %1639 = vrot.lane.b32.xlu1 %v1545_v19, %s2739_s28  ;;  %1877 = vst.msk [vmem:[#allocation3 + $0x40] sm:$0xff] %vm1868_vm10, %v1789_v60 }
 0x21a   : > { %1800 = vrot.lane.b32.xlu0 %v1722_v15, %s2740_s10 }
 0x21b   : > { %v1630_v29 = vpop.permute.xlu1 %1629 }
 0x21c   : > { %1701 = vst.msk [vmem:[#allocation3 + $0xc8] sm:$0xff] %vm1675_vm9, %v1630_v29  ;;  %v1022_v62 = vpop.permute.xlu0 %1021 }
 0x21d   : > { %1641 = vrot.lane.b32.xlu1 %v1546_v21, %s2739_s28  ;;  %1107 = vst.msk [vmem:[#allocation3 + $0x58] sm:$0xff] %vm1095_vm6, %v1022_v62 }
 0x21e   : > { %1802 = vrot.lane.b32.xlu0 %v1723_v25, %s2740_s10 }
 0x21f   : > { %v1821_v27 = vpop.permute.xlu1 %1820 }
 0x220   : > { %1893 = vst.msk [vmem:[#allocation3 + $0xc0] sm:$0xff] %vm1868_vm10, %v1821_v27  ;;  %v1213_v30 = vpop.permute.xlu0 %1212  ;;  %v1909_v43 = vld [vmem:[#allocation3 + $0x40] sm:$0xff] }
 0x221   : > { %1832 = vrot.lane.b32.xlu1 %v1738_v0, %s2740_s10  ;;  %1299 = vst.msk [vmem:[#allocation3 + $0x50] sm:$0xff] %vm1288_vm7, %v1213_v30  ;;  %2657 = vmatprep.mubr.msk.f32.mxu0 %vm1945_vm11, %v1909_v43 }
 0x223   : > { %v1054_v13 = vpop.permute.xlu1 %1053 }
 0x224   : > { %1123 = vst.msk [vmem:[#allocation3 + $0xd8] sm:$0xff] %vm1095_vm6, %v1054_v13  ;;  %v1791_v35 = vpop.permute.xlu0 %1790 }
 0x225   : > { %1834 = vrot.lane.b32.xlu1 %v1739_v1, %s2740_s10  ;;  %1878 = vst.msk [vmem:[#allocation3 + $0x48] sm:$0xff] %vm1868_vm10, %v1791_v35 }
 0x227   : > { %v1245_v46 = vpop.permute.xlu1 %1244  ;;  %v1925_v56 = vld [vmem:[#allocation3 + $0xc0] sm:$0xff] }
 0x228   : > { %1315 = vst.msk [vmem:[#allocation3 + $0xd0] sm:$0xff] %vm1288_vm7, %v1245_v46  ;;  %2681 = vmatprep.mubr.msk.f32.mxu1 %vm1945_vm11, %v1925_v56  ;;  %v1215_v28 = vpop.permute.xlu0 %1214 }
 0x229   : > { %1300 = vst.msk [vmem:[#allocation3 + $0x58] sm:$0xff] %vm1288_vm7, %v1215_v28 }
 0x22b   : > { %v1823_v55 = vpop.permute.xlu1 %1822 }
 0x22c   : > { %1894 = vst.msk [vmem:[#allocation3 + $0xc8] sm:$0xff] %vm1868_vm10, %v1823_v55  ;;  %v1407_v38 = vpop.permute.xlu0 %1406  ;;  %v1910_v59 = vld [vmem:[#allocation3 + $0x48] sm:$0xff] }
 0x22d   : > { %1493 = vst.msk [vmem:[#allocation3 + $0x50] sm:$0xff] %vm1482_vm8, %v1407_v38  ;;  %2658 = vmatmul.mubr.msk.f32.gmra.mrb[8].mxu0 %vm1945_vm11, %v1910_v59 }
 0x22f   : > { %v1247_v39 = vpop.permute.xlu1 %1246 }
 0x230   : > { %1316 = vst.msk [vmem:[#allocation3 + $0xd8] sm:$0xff] %vm1288_vm7, %v1247_v39  ;;  %v1409_v16 = vpop.permute.xlu0 %1408 }
 0x231   : > { %1494 = vst.msk [vmem:[#allocation3 + $0x58] sm:$0xff] %vm1482_vm8, %v1409_v16 }
 0x233   : > { %v1439_v9 = vpop.permute.xlu1 %1438  ;;  %v1926_v34 = vld [vmem:[#allocation3 + $0xc8] sm:$0xff] }
 0x234   : > { %1509 = vst.msk [vmem:[#allocation3 + $0xd0] sm:$0xff] %vm1482_vm8, %v1439_v9  ;;  %2682 = vmatmul.mubr.msk.f32.gmra.mrb[8].mxu1 %vm1945_vm11, %v1926_v34  ;;  %v1600_v22 = vpop.permute.xlu0 %1599 }
 0x235   : > { %1686 = vst.msk [vmem:[#allocation3 + $0x50] sm:$0xff] %vm1675_vm9, %v1600_v22 }
 0x237   : > { %v1441_v42 = vpop.permute.xlu1 %1440 }
 0x238   : > { %1510 = vst.msk [vmem:[#allocation3 + $0xd8] sm:$0xff] %vm1482_vm8, %v1441_v42  ;;  %v1024_v14 = vpop.permute.xlu0 %1023 }
 0x239   : > { %1108 = vst.msk [vmem:[#allocation3 + $0x60] sm:$0xff] %vm1095_vm6, %v1024_v14 }
 0x23b   : > { %v1632_v5 = vpop.permute.xlu1 %1631 }
 0x23c   : > { %1702 = vst.msk [vmem:[#allocation3 + $0xd0] sm:$0xff] %vm1675_vm9, %v1632_v5  ;;  %v1602_v49 = vpop.permute.xlu0 %1601 }
 0x23d   : > { %1687 = vst.msk [vmem:[#allocation3 + $0x58] sm:$0xff] %vm1675_vm9, %v1602_v49 }
 0x23f   : > { %v1056_v8 = vpop.permute.xlu1 %1055 }
 0x240   : > { %1124 = vst.msk [vmem:[#allocation3 + $0xe0] sm:$0xff] %vm1095_vm6, %v1056_v8  ;;  %v1793_v54 = vpop.permute.xlu0 %1792 }
 0x241   : > { %1879 = vst.msk [vmem:[#allocation3 + $0x50] sm:$0xff] %vm1868_vm10, %v1793_v54 }
 0x243   : > { %v1634_v2 = vpop.permute.xlu1 %1633 }
 0x244   : > { %1703 = vst.msk [vmem:[#allocation3 + $0xd8] sm:$0xff] %vm1675_vm9, %v1634_v2  ;;  %v1026_v3 = vpop.permute.xlu0 %1025 }
 0x245   : > { %1109 = vst.msk [vmem:[#allocation3 + $0x68] sm:$0xff] %vm1095_vm6, %v1026_v3 }
 0x247   : > { %v1825_v26 = vpop.permute.xlu1 %1824 }
 0x248   : > { %1895 = vst.msk [vmem:[#allocation3 + $0xd0] sm:$0xff] %vm1868_vm10, %v1825_v26  ;;  %v1217_v4 = vpop.permute.xlu0 %1216  ;;  %v1911_v23 = vld [vmem:[#allocation3 + $0x50] sm:$0xff] }
 0x249   : > { %1301 = vst.msk [vmem:[#allocation3 + $0x60] sm:$0xff] %vm1288_vm7, %v1217_v4  ;;  %2660 = vmatprep.mubr.msk.f32.mxu0 %vm1945_vm11, %v1911_v23 }
 0x24b   : > { %v1058_v31 = vpop.permute.xlu1 %1057 }
 0x24c   : > { %1125 = vst.msk [vmem:[#allocation3 + $0xe8] sm:$0xff] %vm1095_vm6, %v1058_v31  ;;  %v1795_v6 = vpop.permute.xlu0 %1794 }
 0x24d   : > { %1880 = vst.msk [vmem:[#allocation3 + $0x58] sm:$0xff] %vm1868_vm10, %v1795_v6 }
 0x24f   : > { %v1249_v45 = vpop.permute.xlu1 %1248  ;;  %v1927_v11 = vld [vmem:[#allocation3 + $0xd0] sm:$0xff] }
 0x250   : > { %1317 = vst.msk [vmem:[#allocation3 + $0xe0] sm:$0xff] %vm1288_vm7, %v1249_v45  ;;  %2684 = vmatprep.mubr.msk.f32.mxu1 %vm1945_vm11, %v1927_v11  ;;  %v1219_v48 = vpop.permute.xlu0 %1218 }
 0x251   : > { %1302 = vst.msk [vmem:[#allocation3 + $0x68] sm:$0xff] %vm1288_vm7, %v1219_v48 }
 0x253   : > { %v1827_v50 = vpop.permute.xlu1 %1826 }
 0x254   : > { %1896 = vst.msk [vmem:[#allocation3 + $0xd8] sm:$0xff] %vm1868_vm10, %v1827_v50  ;;  %v1411_v24 = vpop.permute.xlu0 %1410  ;;  %v1912_v32 = vld [vmem:[#allocation3 + $0x58] sm:$0xff] }
 0x255   : > { %1495 = vst.msk [vmem:[#allocation3 + $0x60] sm:$0xff] %vm1482_vm8, %v1411_v24  ;;  %2661 = vmatmul.mubr.msk.f32.gmra.mrb[10].mxu0 %vm1945_vm11, %v1912_v32 }
 0x257   : > { %v1251_v17 = vpop.permute.xlu1 %1250 }
 0x258   : > { %1318 = vst.msk [vmem:[#allocation3 + $0xe8] sm:$0xff] %vm1288_vm7, %v1251_v17  ;;  %v1413_v51 = vpop.permute.xlu0 %1412 }
 0x259   : > { %1496 = vst.msk [vmem:[#allocation3 + $0x68] sm:$0xff] %vm1482_vm8, %v1413_v51 }
 0x25b   : > { %v1443_v58 = vpop.permute.xlu1 %1442  ;;  %v1928_v37 = vld [vmem:[#allocation3 + $0xd8] sm:$0xff] }
 0x25c   : > { %1511 = vst.msk [vmem:[#allocation3 + $0xe0] sm:$0xff] %vm1482_vm8, %v1443_v58  ;;  %2685 = vmatmul.mubr.msk.f32.gmra.mrb[10].mxu1 %vm1945_vm11, %v1928_v37  ;;  %v1604_v61 = vpop.permute.xlu0 %1603 }
 0x25d   : > { %1688 = vst.msk [vmem:[#allocation3 + $0x60] sm:$0xff] %vm1675_vm9, %v1604_v61 }
 0x25f   : > { %v1445_v40 = vpop.permute.xlu1 %1444 }
 0x260   : > { %1512 = vst.msk [vmem:[#allocation3 + $0xe8] sm:$0xff] %vm1482_vm8, %v1445_v40  ;;  %v1028_v33 = vpop.permute.xlu0 %1027 }
 0x261   : > { %1110 = vst.msk [vmem:[#allocation3 + $0x70] sm:$0xff] %vm1095_vm6, %v1028_v33 }
 0x263   : > { %v1636_v12 = vpop.permute.xlu1 %1635 }
 0x264   : > { %1704 = vst.msk [vmem:[#allocation3 + $0xe0] sm:$0xff] %vm1675_vm9, %v1636_v12  ;;  %v1606_v41 = vpop.permute.xlu0 %1605  ;;  %v3776_v47 = vpop.f32.mrb[0].mxu1 }
 0x265   : > { %1689 = vst.msk [vmem:[#allocation3 + $0x68] sm:$0xff] %vm1675_vm9, %v1606_v41  ;;  %v3779_v18 = vpop.f32.mrb[1].mxu1 }
 0x267   : > { %v2647_v36 = vpop.f32.mrb[0].mxu0  ;;  %v1060_v44 = vpop.permute.xlu1 %1059 }
 0x268   : > { %v2118_v7 = vadd.f32 %v2647_v36, %v3784_v53  ;;  %1126 = vst.msk [vmem:[#allocation3 + $0xf0] sm:$0xff] %vm1095_vm6, %v1060_v44  ;;  %v2112_v63 = vpop.f32.mrb[1].mxu0  ;;  %v1797_v52 = vpop.permute.xlu0 %1796 }
 0x269   : > { %v2113_v20 = vadd.f32 %v3784_v53, %v2112_v63  ;;  %1881 = vst.msk [vmem:[#allocation3 + $0x60] sm:$0xff] %vm1868_vm10, %v1797_v52 }
 0x26a   : > { %v2272_v10 = vmax.f32 %v2118_v7, 0.0 }
 0x26b   : > { %v2271_v19 = vmax.f32 %v2113_v20, 0.0  ;;  %v1638_v57 = vpop.permute.xlu1 %1637 }
 0x26c   : > { %1705 = vst.msk [vmem:[#allocation3 + $0xe8] sm:$0xff] %vm1675_vm9, %v1638_v57  ;;  %2369 = vrot.lane.b32.xlu1 %v2272_v10, %s2733_s22  ;;  %v1030_v15 = vpop.permute.xlu0 %1029 }
 0x26d   : > { %2367 = vrot.lane.b32.xlu0 %v2271_v19, %s2733_s22  ;;  %1111 = vst.msk [vmem:[#allocation3 + $0x78] sm:$0xff] %vm1095_vm6, %v1030_v15 }
 0x26f   : > { %v1829_v60 = vpop.permute.xlu1 %1828 }
 0x270   : > { %1897 = vst.msk [vmem:[#allocation3 + $0xe0] sm:$0xff] %vm1868_vm10, %v1829_v60  ;;  %v1221_v21 = vpop.permute.xlu0 %1220  ;;  %v1913_v29 = vld [vmem:[#allocation3 + $0x60] sm:$0xff] }
 0x271   : > { %1303 = vst.msk [vmem:[#allocation3 + $0x70] sm:$0xff] %vm1288_vm7, %v1221_v21  ;;  %2663 = vmatprep.mubr.msk.f32.mxu0 %vm1945_vm11, %v1913_v29 }
 0x273   : > { %v1062_v25 = vpop.permute.xlu1 %1061 }
 0x274   : > { %1127 = vst.msk [vmem:[#allocation3 + $0xf8] sm:$0xff] %vm1095_vm6, %v1062_v25  ;;  %v1799_v62 = vpop.permute.xlu0 %1798 }
 0x275   : > { %1882 = vst.msk [vmem:[#allocation3 + $0x68] sm:$0xff] %vm1868_vm10, %v1799_v62 }
 0x277   : > { %v1253_v0 = vpop.permute.xlu1 %1252  ;;  %v1929_v27 = vld [vmem:[#allocation3 + $0xe0] sm:$0xff] }
 0x278   : > { %1319 = vst.msk [vmem:[#allocation3 + $0xf0] sm:$0xff] %vm1288_vm7, %v1253_v0  ;;  %2687 = vmatprep.mubr.msk.f32.mxu1 %vm1945_vm11, %v1929_v27  ;;  %v1223_v30 = vpop.permute.xlu0 %1222 }
 0x279   : > { %1304 = vst.msk [vmem:[#allocation3 + $0x78] sm:$0xff] %vm1288_vm7, %v1223_v30 }
 0x27b   : > { %v1831_v43 = vpop.permute.xlu1 %1830 }
 0x27c   : > { %1898 = vst.msk [vmem:[#allocation3 + $0xe8] sm:$0xff] %vm1868_vm10, %v1831_v43  ;;  %v1415_v1 = vpop.permute.xlu0 %1414  ;;  %v1914_v13 = vld [vmem:[#allocation3 + $0x68] sm:$0xff] }
 0x27d   : > { %1497 = vst.msk [vmem:[#allocation3 + $0x70] sm:$0xff] %vm1482_vm8, %v1415_v1  ;;  %2664 = vmatmul.mubr.msk.f32.gmra.mrb[12].mxu0 %vm1945_vm11, %v1914_v13 }
 0x27f   : > { %v1255_v35 = vpop.permute.xlu1 %1254 }
 0x280   : > { %1320 = vst.msk [vmem:[#allocation3 + $0xf8] sm:$0xff] %vm1288_vm7, %v1255_v35  ;;  %v1417_v46 = vpop.permute.xlu0 %1416 }
 0x281   : > { %1498 = vst.msk [vmem:[#allocation3 + $0x78] sm:$0xff] %vm1482_vm8, %v1417_v46 }
 0x283   : > { %v1447_v56 = vpop.permute.xlu1 %1446  ;;  %v1930_v28 = vld [vmem:[#allocation3 + $0xe8] sm:$0xff] }
 0x284   : > { %1513 = vst.msk [vmem:[#allocation3 + $0xf0] sm:$0xff] %vm1482_vm8, %v1447_v56  ;;  %2688 = vmatmul.mubr.msk.f32.gmra.mrb[12].mxu1 %vm1945_vm11, %v1930_v28  ;;  %v1608_v55 = vpop.permute.xlu0 %1607 }
 0x285   : > { %1690 = vst.msk [vmem:[#allocation3 + $0x70] sm:$0xff] %vm1675_vm9, %v1608_v55 }
 0x287   : > { %v1449_v38 = vpop.permute.xlu1 %1448 }
 0x288   : > { %1514 = vst.msk [vmem:[#allocation3 + $0xf8] sm:$0xff] %vm1482_vm8, %v1449_v38  ;;  %v1610_v59 = vpop.permute.xlu0 %1609  ;;  %v2650_v39 = vpop.f32.mrb[2].mxu0 }
 0x289   : > { %1691 = vst.msk [vmem:[#allocation3 + $0x78] sm:$0xff] %vm1675_vm9, %v1610_v59  ;;  %v2128_v16 = vadd.f32 %v2650_v39, %v3784_v53  ;;  %v2122_v9 = vpop.f32.mrb[3].mxu0 }
 0x28a   : > { %v2123_v34 = vadd.f32 %v3784_v53, %v2122_v9 }
 0x28b   : > { %v1640_v22 = vpop.permute.xlu1 %1639  ;;  %v2274_v42 = vmax.f32 %v2128_v16, 0.0 }
 0x28c   : > { %1706 = vst.msk [vmem:[#allocation3 + $0xf0] sm:$0xff] %vm1675_vm9, %v1640_v22  ;;  %v2273_v14 = vmax.f32 %v2123_v34, 0.0  ;;  %v1801_v5 = vpop.permute.xlu0 %1800 }
 0x28d   : > { %1883 = vst.msk [vmem:[#allocation3 + $0x70] sm:$0xff] %vm1868_vm10, %v1801_v5  ;;  %2373 = vrot.lane.b32.xlu1 %v2274_v42, %s2733_s22 }
 0x28e   : > { %2371 = vrot.lane.b32.xlu0 %v2273_v14, %s2733_s22 }
 0x28f   : > { %v3818_v49 = vpop.f32.mrb[2].mxu1  ;;  %v1642_v8 = vpop.permute.xlu1 %1641 }
 0x290   : > { %1707 = vst.msk [vmem:[#allocation3 + $0xf8] sm:$0xff] %vm1675_vm9, %v1642_v8  ;;  %v3821_v54 = vpop.f32.mrb[3].mxu1  ;;  %v1803_v2 = vpop.permute.xlu0 %1802 }
 0x291   : > { %1884 = vst.msk [vmem:[#allocation3 + $0x78] sm:$0xff] %vm1868_vm10, %v1803_v2  ;;  %v2198_v2 = vadd.f32 %v3776_v47, %v3784_v53  ;;  %v2203_v47 = vadd.f32 %v3784_v53, %v3821_v54 }
 0x293   : > { %v1833_v3 = vpop.permute.xlu1 %1832 }
 0x294   : > { %1899 = vst.msk [vmem:[#allocation3 + $0xf0] sm:$0xff] %vm1868_vm10, %v1833_v3  ;;  %v1915_v26 = vld [vmem:[#allocation3 + $0x70] sm:$0xff] }
 0x295   : > { %2666 = vmatprep.mubr.msk.f32.mxu0 %vm1945_vm11, %v1915_v26  ;;  %v2193_v26 = vadd.f32 %v3784_v53, %v3779_v18 }
 0x297   : > { %v1835_v4 = vpop.permute.xlu1 %1834 }
 0x298   : > { %1900 = vst.msk [vmem:[#allocation3 + $0xf8] sm:$0xff] %vm1868_vm10, %v1835_v4  ;;  %v1916_v23 = vld [vmem:[#allocation3 + $0x78] sm:$0xff] }
 0x299   : > { %2667 = vmatmul.mubr.msk.f32.gmra.mrb[14].mxu0 %vm1945_vm11, %v1916_v23 }
 0x29b   : > { %v1931_v31 = vld [vmem:[#allocation3 + $0xf0] sm:$0xff] }
 0x29c   : > { %2690 = vmatprep.mubr.msk.f32.mxu1 %vm1945_vm11, %v1931_v31  ;;  %v2288_v31 = vmax.f32 %v2198_v2, 0.0 }
 0x29f   : > { %v1932_v6 = vld [vmem:[#allocation3 + $0xf8] sm:$0xff] }
 0x2a0   : > { %2691 = vmatmul.mubr.msk.f32.gmra.mrb[14].mxu1 %vm1945_vm11, %v1932_v6  ;;  %v2208_v6 = vadd.f32 %v3818_v49, %v3784_v53 }
 0x2a2   : > { %v2290_v18 = vmax.f32 %v2208_v6, 0.0 }
 0x2b0   : > { %v2653_v45 = vpop.f32.mrb[4].mxu0 }
 0x2b1   : > { %v2138_v11 = vadd.f32 %v2653_v45, %v3784_v53  ;;  %v2132_v48 = vpop.f32.mrb[5].mxu0 }
 0x2b2   : > { %v2133_v50 = vadd.f32 %v3784_v53, %v2132_v48 }
 0x2b3   : > { %v2276_v24 = vmax.f32 %v2138_v11, 0.0  ;;  %v2287_v11 = vmax.f32 %v2193_v26, 0.0 }
 0x2b4   : > { %v2275_v32 = vmax.f32 %v2133_v50, 0.0 }
 0x2b5   : > { %2377 = vrot.lane.b32.xlu1 %v2276_v24, %s2733_s22  ;;  %v2289_v24 = vmax.f32 %v2203_v47, 0.0 }
 0x2b6   : > { %2375 = vrot.lane.b32.xlu0 %v2275_v32, %s2733_s22 }
 0x2b7   : > { %v3834_v17 = vpop.f32.mrb[4].mxu1 }
 0x2b8   : > { %v3836_v51 = vpop.f32.mrb[5].mxu1  ;;  %v2218_v48 = vadd.f32 %v3834_v17, %v3784_v53 }
 0x2b9   : > { %v2213_v32 = vadd.f32 %v3784_v53, %v3836_v51 }
 0x2ba   : > { %v2292_v54 = vmax.f32 %v2218_v48, 0.0 }
 0x2d8   : > { %v2656_v58 = vpop.f32.mrb[6].mxu0 }
 0x2d9   : > { %v2148_v37 = vadd.f32 %v2656_v58, %v3784_v53  ;;  %v2142_v61 = vpop.f32.mrb[7].mxu0 }
 0x2da   : > { %v2143_v40 = vadd.f32 %v3784_v53, %v2142_v61 }
 0x2db   : > { %v2278_v33 = vmax.f32 %v2148_v37, 0.0  ;;  %v2291_v37 = vmax.f32 %v2213_v32, 0.0 }
 0x2dc   : > { %v2277_v12 = vmax.f32 %v2143_v40, 0.0 }
 0x2dd   : > { %2381 = vrot.lane.b32.xlu1 %v2278_v33, %s2733_s22 }
 0x2de   : > { %v2370_v41 = vpop.permute.xlu1 %2369  ;;  %2379 = vrot.lane.b32.xlu0 %v2277_v12, %s2733_s22 }
 0x2df   : > { %v2368_v36 = vpop.permute.xlu0 %2367  ;;  %v3842_v44 = vpop.f32.mrb[6].mxu1  ;;  %2465 = vst.msk [vmem:[%s2841_s21 + $0x8] sm:$0xff] %vm2463_vm12, %v2370_v41 }
 0x2e0   : > { %2464 = vst.msk [vmem:[%s2841_s21] sm:$0xff] %vm2463_vm12, %v2368_v36  ;;  %v3848_v7 = vpop.f32.mrb[7].mxu1  ;;  %v2228_v58 = vadd.f32 %v3842_v44, %v3784_v53 }
 0x2e1   : > { %v2223_v17 = vadd.f32 %v3784_v53, %v3848_v7 }
 0x2e2   : > { %v2294_v51 = vmax.f32 %v2228_v58, 0.0 }
 0x2e3   : > { %v2293_v40 = vmax.f32 %v2223_v17, 0.0 }
 0x2ff   : > { %v2374_v63 = vpop.permute.xlu1 %2373 }
 0x300   : > { %2467 = vst.msk [vmem:[%s2841_s21 + $0x18] sm:$0xff] %vm2463_vm12, %v2374_v63  ;;  %v2659_v52 = vpop.f32.mrb[8].mxu0  ;;  %v2372_v20 = vpop.permute.xlu0 %2371 }
 0x301   : > { %v2158_v10 = vadd.f32 %v2659_v52, %v3784_v53  ;;  %2466 = vst.msk [vmem:[%s2841_s21 + $0x10] sm:$0xff] %vm2463_vm12, %v2372_v20  ;;  %v2152_v19 = vpop.f32.mrb[9].mxu0 }
 0x302   : > { %v2153_v57 = vadd.f32 %v3784_v53, %v2152_v19 }
 0x303   : > { %v2280_v15 = vmax.f32 %v2158_v10, 0.0 }
 0x304   : > { %v2279_v60 = vmax.f32 %v2153_v57, 0.0 }
 0x305   : > { %2385 = vrot.lane.b32.xlu1 %v2280_v15, %s2733_s22 }
 0x306   : > { %2383 = vrot.lane.b32.xlu0 %v2279_v60, %s2733_s22 }
 0x307   : > { %v3858_v21 = vpop.f32.mrb[8].mxu1 }
 0x308   : > { %v3860_v29 = vpop.f32.mrb[9].mxu1  ;;  %v2238_v61 = vadd.f32 %v3858_v21, %v3784_v53 }
 0x309   : > { %v2233_v33 = vadd.f32 %v3784_v53, %v3860_v29 }
 0x30a   : > { %v2296_v12 = vmax.f32 %v2238_v61, 0.0 }
 0x30b   : > { %v2295_v36 = vmax.f32 %v2233_v33, 0.0 }
 0x327   : > { %v2378_v25 = vpop.permute.xlu1 %2377 }
 0x328   : > { %2469 = vst.msk [vmem:[%s2841_s21 + $0x28] sm:$0xff] %vm2463_vm12, %v2378_v25  ;;  %v2662_v62 = vpop.f32.mrb[10].mxu0  ;;  %v2376_v0 = vpop.permute.xlu0 %2375 }
 0x329   : > { %v2168_v27 = vadd.f32 %v2662_v62, %v3784_v53  ;;  %2468 = vst.msk [vmem:[%s2841_s21 + $0x20] sm:$0xff] %vm2463_vm12, %v2376_v0  ;;  %v2162_v30 = vpop.f32.mrb[11].mxu0 }
 0x32a   : > { %v2163_v43 = vadd.f32 %v3784_v53, %v2162_v30 }
 0x32b   : > { %v2282_v1 = vmax.f32 %v2168_v27, 0.0 }
 0x32c   : > { %v2281_v13 = vmax.f32 %v2163_v43, 0.0 }
 0x32d   : > { %2389 = vrot.lane.b32.xlu1 %v2282_v1, %s2733_s22 }
 0x32e   : > { %2387 = vrot.lane.b32.xlu0 %v2281_v13, %s2733_s22 }
 0x32f   : > { %v2686_v35 = vpop.f32.mrb[10].mxu1 }
 0x330   : > { %v2242_v46 = vpop.f32.mrb[11].mxu1  ;;  %v2248_v41 = vadd.f32 %v2686_v35, %v3784_v53 }
 0x331   : > { %v2243_v44 = vadd.f32 %v3784_v53, %v2242_v46 }
 0x332   : > { %v2298_v7 = vmax.f32 %v2248_v41, 0.0 }
 0x333   : > { %v2297_v52 = vmax.f32 %v2243_v44, 0.0 }
 0x34f   : > { %v2382_v56 = vpop.permute.xlu1 %2381 }
 0x350   : > { %2471 = vst.msk [vmem:[%s2841_s21 + $0x38] sm:$0xff] %vm2463_vm12, %v2382_v56  ;;  %v2665_v28 = vpop.f32.mrb[12].mxu0  ;;  %v2380_v55 = vpop.permute.xlu0 %2379 }
 0x351   : > { %v2178_v38 = vadd.f32 %v2665_v28, %v3784_v53  ;;  %2470 = vst.msk [vmem:[%s2841_s21 + $0x30] sm:$0xff] %vm2463_vm12, %v2380_v55  ;;  %v2172_v59 = vpop.f32.mrb[13].mxu0 }
 0x352   : > { %v2173_v39 = vadd.f32 %v3784_v53, %v2172_v59 }
 0x353   : > { %v2284_v16 = vmax.f32 %v2178_v38, 0.0 }
 0x354   : > { %v2283_v9 = vmax.f32 %v2173_v39, 0.0 }
 0x355   : > { %2393 = vrot.lane.b32.xlu1 %v2284_v16, %s2733_s22 }
 0x356   : > { %2391 = vrot.lane.b32.xlu0 %v2283_v9, %s2733_s22 }
 0x357   : > { %v2689_v34 = vpop.f32.mrb[12].mxu1 }
 0x358   : > { %v2252_v22 = vpop.f32.mrb[13].mxu1  ;;  %v2258_v63 = vadd.f32 %v2689_v34, %v3784_v53 }
 0x359   : > { %v2253_v20 = vadd.f32 %v3784_v53, %v2252_v22 }
 0x35a   : > { %v2300_v57 = vmax.f32 %v2258_v63, 0.0 }
 0x35b   : > { %v2299_v15 = vmax.f32 %v2253_v20, 0.0 }
 0x36c   : > { %v2668_v42 = vpop.f32.mrb[14].mxu0 }
 0x36d   : > { %v2188_v14 = vadd.f32 %v2668_v42, %v3784_v53  ;;  %v2182_v5 = vpop.f32.mrb[15].mxu0 }
 0x36e   : > { %v2183_v8 = vadd.f32 %v3784_v53, %v2182_v5 }
 0x36f   : > { %v2286_v3 = vmax.f32 %v2188_v14, 0.0 }
 0x370   : > { %v2285_v4 = vmax.f32 %v2183_v8, 0.0 }
 0x371   : > { %2397 = vrot.lane.b32.xlu1 %v2286_v3, %s2733_s22 }
 0x372   : > { %2395 = vrot.lane.b32.xlu0 %v2285_v4, %s2733_s22 }
 0x373   : > { %v2692_v23 = vpop.f32.mrb[14].mxu1 }
 0x374   : > { %v2262_v45 = vpop.f32.mrb[15].mxu1  ;;  %v2268_v10 = vadd.f32 %v2692_v23, %v3784_v53 }
 0x375   : > { %2401 = vrot.lane.b32.xlu1 %v2288_v31, %s2733_s22  ;;  %v2263_v19 = vadd.f32 %v3784_v53, %v2262_v45 }
 0x376   : > { %2399 = vrot.lane.b32.xlu0 %v2287_v11, %s2733_s22  ;;  %v2302_v60 = vmax.f32 %v2268_v10, 0.0 }
 0x377   : > { %v2386_v50 = vpop.permute.xlu1 %2385  ;;  %v2301_v21 = vmax.f32 %v2263_v19, 0.0 }
 0x378   : > { %2473 = vst.msk [vmem:[%s2841_s21 + $0x48] sm:$0xff] %vm2463_vm12, %v2386_v50  ;;  %v2384_v49 = vpop.permute.xlu0 %2383 }
 0x379   : > { %2472 = vst.msk [vmem:[%s2841_s21 + $0x40] sm:$0xff] %vm2463_vm12, %v2384_v49  ;;  %2405 = vrot.lane.b32.xlu1 %v2290_v18, %s2733_s22 }
 0x37a   : > { %2403 = vrot.lane.b32.xlu0 %v2289_v24, %s2733_s22 }
 0x37d   : > { %2409 = vrot.lane.b32.xlu1 %v2292_v54, %s2733_s22 }
 0x37e   : > { %2407 = vrot.lane.b32.xlu0 %v2291_v37, %s2733_s22 }
 0x381   : > { %2413 = vrot.lane.b32.xlu1 %v2294_v51, %s2733_s22 }
 0x382   : > { %2411 = vrot.lane.b32.xlu0 %v2293_v40, %s2733_s22 }
 0x385   : > { %2417 = vrot.lane.b32.xlu1 %v2296_v12, %s2733_s22 }
 0x386   : > { %2415 = vrot.lane.b32.xlu0 %v2295_v36, %s2733_s22 }
 0x389   : > { %2421 = vrot.lane.b32.xlu1 %v2298_v7, %s2733_s22 }
 0x38a   : > { %2419 = vrot.lane.b32.xlu0 %v2297_v52, %s2733_s22 }
 0x38d   : > { %2425 = vrot.lane.b32.xlu1 %v2300_v57, %s2733_s22 }
 0x38e   : > { %2423 = vrot.lane.b32.xlu0 %v2299_v15, %s2733_s22 }
 0x391   : > { %2429 = vrot.lane.b32.xlu1 %v2302_v60, %s2733_s22 }
 0x392   : > { %2427 = vrot.lane.b32.xlu0 %v2301_v21, %s2733_s22 }
 0x39f   : > { %v2390_v29 = vpop.permute.xlu1 %2389 }
 0x3a0   : > { %2475 = vst.msk [vmem:[%s2841_s21 + $0x58] sm:$0xff] %vm2463_vm12, %v2390_v29  ;;  %v2388_v53 = vpop.permute.xlu0 %2387 }
 0x3a1   : > { %2474 = vst.msk [vmem:[%s2841_s21 + $0x50] sm:$0xff] %vm2463_vm12, %v2388_v53 }
 0x3c7   : > { %v2394_v25 = vpop.permute.xlu1 %2393 }
 0x3c8   : > { %2477 = vst.msk [vmem:[%s2841_s21 + $0x68] sm:$0xff] %vm2463_vm12, %v2394_v25  ;;  %v2392_v62 = vpop.permute.xlu0 %2391 }
 0x3c9   : > { %2476 = vst.msk [vmem:[%s2841_s21 + $0x60] sm:$0xff] %vm2463_vm12, %v2392_v62 }
 0x3e3   : > { %v2398_v0 = vpop.permute.xlu1 %2397 }
 0x3e4   : > { %2479 = vst.msk [vmem:[%s2841_s21 + $0x78] sm:$0xff] %vm2463_vm12, %v2398_v0  ;;  %v2396_v27 = vpop.permute.xlu0 %2395 }
 0x3e5   : > { %2478 = vst.msk [vmem:[%s2841_s21 + $0x70] sm:$0xff] %vm2463_vm12, %v2396_v27 }
 0x3e7   : > { %v2402_v30 = vpop.permute.xlu1 %2401 }
 0x3e8   : > { %2481 = vst.msk [vmem:[%s2841_s21 + $0x88] sm:$0xff] %vm2463_vm12, %v2402_v30  ;;  %v2400_v43 = vpop.permute.xlu0 %2399 }
 0x3e9   : > { %2480 = vst.msk [vmem:[%s2841_s21 + $0x80] sm:$0xff] %vm2463_vm12, %v2400_v43 }
 0x3eb   : > { %v2406_v1 = vpop.permute.xlu1 %2405 }
 0x3ec   : > { %2483 = vst.msk [vmem:[%s2841_s21 + $0x98] sm:$0xff] %vm2463_vm12, %v2406_v1  ;;  %v2404_v13 = vpop.permute.xlu0 %2403 }
 0x3ed   : > { %2482 = vst.msk [vmem:[%s2841_s21 + $0x90] sm:$0xff] %vm2463_vm12, %v2404_v13 }
 0x3ef   : > { %v2410_v35 = vpop.permute.xlu1 %2409 }
 0x3f0   : > { %2485 = vst.msk [vmem:[%s2841_s21 + $0xa8] sm:$0xff] %vm2463_vm12, %v2410_v35  ;;  %v2408_v46 = vpop.permute.xlu0 %2407 }
 0x3f1   : > { %2484 = vst.msk [vmem:[%s2841_s21 + $0xa0] sm:$0xff] %vm2463_vm12, %v2408_v46 }
 0x3f3   : > { %v2414_v56 = vpop.permute.xlu1 %2413 }
 0x3f4   : > { %2487 = vst.msk [vmem:[%s2841_s21 + $0xb8] sm:$0xff] %vm2463_vm12, %v2414_v56  ;;  %v2412_v28 = vpop.permute.xlu0 %2411 }
 0x3f5   : > { %2486 = vst.msk [vmem:[%s2841_s21 + $0xb0] sm:$0xff] %vm2463_vm12, %v2412_v28 }
 0x3f7   : > { %v2418_v55 = vpop.permute.xlu1 %2417 }
 0x3f8   : > { %2489 = vst.msk [vmem:[%s2841_s21 + $0xc8] sm:$0xff] %vm2463_vm12, %v2418_v55  ;;  %v2416_v38 = vpop.permute.xlu0 %2415 }
 0x3f9   : > { %2488 = vst.msk [vmem:[%s2841_s21 + $0xc0] sm:$0xff] %vm2463_vm12, %v2416_v38 }
 0x3fb   : > { %v2422_v59 = vpop.permute.xlu1 %2421 }
 0x3fc   : > { %2491 = vst.msk [vmem:[%s2841_s21 + $0xd8] sm:$0xff] %vm2463_vm12, %v2422_v59  ;;  %v2420_v39 = vpop.permute.xlu0 %2419 }
 0x3fd   : > { %2490 = vst.msk [vmem:[%s2841_s21 + $0xd0] sm:$0xff] %vm2463_vm12, %v2420_v39 }
 0x3ff   : > { %v2426_v16 = vpop.permute.xlu1 %2425 }
 0x400   : > { %2493 = vst.msk [vmem:[%s2841_s21 + $0xe8] sm:$0xff] %vm2463_vm12, %v2426_v16  ;;  %v2424_v9 = vpop.permute.xlu0 %2423 }
 0x401   : > { %2492 = vst.msk [vmem:[%s2841_s21 + $0xe0] sm:$0xff] %vm2463_vm12, %v2424_v9 }
 0x403   : > { %v2430_v34 = vpop.permute.xlu1 %2429 }
 0x404   : > { %2495 = vst.msk [vmem:[%s2841_s21 + $0xf8] sm:$0xff] %vm2463_vm12, %v2430_v34  ;;  %v2428_v22 = vpop.permute.xlu0 %2427 }
 0x405   : > { %2494 = vst.msk [vmem:[%s2841_s21 + $0xf0] sm:$0xff] %vm2463_vm12, %v2428_v22 }
 0x406 PF: > { %s13_s12 = sadd.s32 1, %s2730_s12  }
 0x407   : > { %p10_p4 = scmp.ge.s32.totalorder %s13_s12, 4  }
 0x409   :  { %12 = sbr.rel (!%p10_p4) target bundleno = 1 (0x1), region = 64 }

</bundles_post_ra>
